<compile_context>
chip_gen: v6e
topology: v6e:2x2x1
jax: 0.10.0
libtpu: 0.0.40
codegen_flags: <defaults>
</compile_context>

<pallas_src>
import functools
import math

import jax
import jax.numpy as jnp
import numpy as np
from jax.experimental import pallas as pl
from jax.experimental.pallas import tpu as pltpu


# ----------------------------------------------------------------------------
# Fused MHA kernel: one grid step does the whole layer (all batches, all heads).
# ----------------------------------------------------------------------------
def _mha_kernel(q_ref, k_ref, v_ref, mask_ref,
                wq_ref, wk_ref, wv_ref, wo_ref, b_ref,
                o_ref, ctx_ref, *, b, h, d_k, sq, sk):
    # Packed biases: row 0=q, 1=k, 2=v, 3=out. Keep them (1, D) so they broadcast.
    biases = b_ref[...]
    bq = biases[0:1, :]
    bk = biases[1:2, :]
    bv = biases[2:3, :]
    bo = biases[3:4, :]

    # Q/K/V projections for all batches & heads at once on (B*S, D) slabs.
    # Fold the 1/sqrt(d_k) scale into q (cheaper than scaling the (Sq, Sk) scores).
    scale = jnp.float32(1.0 / math.sqrt(d_k))
    q = (jnp.dot(q_ref[...], wq_ref[...], preferred_element_type=jnp.float32) + bq) * scale
    k = jnp.dot(k_ref[...], wk_ref[...], preferred_element_type=jnp.float32) + bk
    v = jnp.dot(v_ref[...], wv_ref[...], preferred_element_type=jnp.float32) + bv

    # Per-batch, per-head attention. B and H are tiny and static here, so a
    # Python-unrolled loop is fine (see TODO above for realistic sizes).
    for bi in range(b):
        mask = mask_ref[bi]                                   # (Sq, Sk), 0/1 float
        bias = jnp.where(mask == 0, jnp.float32(-1e9), jnp.float32(0.0))
        qb = q[bi * sq:(bi + 1) * sq, :]                      # (Sq, D)
        kb = k[bi * sk:(bi + 1) * sk, :]                      # (Sk, D)
        vb = v[bi * sk:(bi + 1) * sk, :]                      # (Sk, D)

        for head in range(h):
            lo = head * d_k
            qh = qb[:, lo:lo + d_k]                           # (Sq, d_k)
            kh = kb[:, lo:lo + d_k]                           # (Sk, d_k)
            vh = vb[:, lo:lo + d_k]                           # (Sk, d_k)

            # Contract last dims directly: no explicit kh.T (no XLU transpose).
            s = jax.lax.dot_general(
                qh, kh, (((1,), (1,)), ((), ())),
                preferred_element_type=jnp.float32) + bias     # (Sq, Sk)

            # Numerically-stable softmax along the key axis; exact normalization.
            s_max = jnp.max(s, axis=-1, keepdims=True)
            p = jnp.exp(s - s_max)
            denom = jnp.sum(p, axis=-1, keepdims=True)

            o = jnp.dot(p, vh, preferred_element_type=jnp.float32)  # (Sq, d_k)
            # Static-offset store into the lane-dense context scratch (no concat).
            ctx_ref[bi * sq:(bi + 1) * sq, lo:lo + d_k] = o / denom

    # Output projection over the full lane-dense (B*Sq, D) context slab.
    out = jnp.dot(ctx_ref[...], wo_ref[...], preferred_element_type=jnp.float32) + bo
    o_ref[...] = out.astype(o_ref.dtype)


# ----------------------------------------------------------------------------
# Wrapper: single pallas_call for the whole layer
# ----------------------------------------------------------------------------
def multi_head_attention(params, query, key, value, mask=None, *, h):
    B, Sq, D = query.shape
    Sk = key.shape[1]
    d_k = D // h

    if mask is None:
        mask2 = jnp.ones((B, Sq, Sk), dtype=jnp.float32)
    else:
        mask2 = jnp.broadcast_to(mask, (B, 1, Sq, Sk)).astype(jnp.float32)[:, 0]

    # Collapse batch into sublanes: (B*S, D) slabs for the projection matmuls.
    q2 = query.reshape(B * Sq, D)
    k2 = key.reshape(B * Sk, D)
    v2 = value.reshape(B * Sk, D)

    # Pack the four (1, D) biases into one (4, D) input (one DMA / one buffer).
    b_all = jnp.concatenate(
        [params["bq"], params["bk"], params["bv"], params["bo"]], axis=0)

    kern = functools.partial(_mha_kernel, b=B, h=h, d_k=d_k, sq=Sq, sk=Sk)
    full2 = lambda i: (0, 0)

    out = pl.pallas_call(
        kern,
        out_shape=jax.ShapeDtypeStruct((B * Sq, D), query.dtype),
        grid=(1,),
        in_specs=[
            pl.BlockSpec((B * Sq, D), full2),              # query  (B*Sq, D)
            pl.BlockSpec((B * Sk, D), full2),              # key    (B*Sk, D)
            pl.BlockSpec((B * Sk, D), full2),              # value  (B*Sk, D)
            pl.BlockSpec((B, Sq, Sk), lambda i: (0, 0, 0)),  # mask (broadcast over heads)
            pl.BlockSpec((D, D), full2),                   # wq
            pl.BlockSpec((D, D), full2),                   # wk
            pl.BlockSpec((D, D), full2),                   # wv
            pl.BlockSpec((D, D), full2),                   # wo
            pl.BlockSpec((4, D), full2),                   # packed biases
        ],
        out_specs=pl.BlockSpec((B * Sq, D), full2),
        scratch_shapes=[pltpu.VMEM((B * Sq, D), jnp.float32)],  # context slab
        compiler_params=pltpu.CompilerParams(
            dimension_semantics=("arbitrary",)),
    )(q2, k2, v2, mask2,
      params["wq"], params["wk"], params["wv"], params["wo"], b_all)

    return out.reshape(B, Sq, D)


# ----------------------------------------------------------------------------
# Pure-JAX reference for correctness checking
# ----------------------------------------------------------------------------
def reference_mha(params, query, key, value, mask, *, h):
    B, Sq, D = query.shape
    d_k = D // h

    def transform(x, w, bvec):
        out = jnp.dot(x, w, precision=jax.lax.Precision.HIGHEST) + bvec[0]
        return jnp.transpose(out.reshape(B, -1, h, d_k), (0, 2, 1, 3))

    q = transform(query, params["wq"], params["bq"])
    k = transform(key, params["wk"], params["bk"])
    v = transform(value, params["wv"], params["bv"])
    s = jnp.einsum("bhqd,bhkd->bhqk", q, k,
                   precision=jax.lax.Precision.HIGHEST) / math.sqrt(d_k)
    if mask is not None:
        s = jnp.where(mask == 0, -1e9, s)
    p = jax.nn.softmax(s, axis=-1)
    o = jnp.einsum("bhqk,bhkd->bhqd", p, v, precision=jax.lax.Precision.HIGHEST)
    o = jnp.transpose(o, (0, 2, 1, 3)).reshape(B, Sq, D)
    return jnp.dot(o, params["wo"], precision=jax.lax.Precision.HIGHEST) + params["bo"][0]


if __name__ == "__main__":
    # Keep all f32 matmuls at full precision so the tolerance can be tight.
    jax.config.update("jax_default_matmul_precision", "highest")

    # small shapes consistent with the module: seq=8, d_model=32, h=4 heads
    B, S, D, H = 2, 8, 32, 4

    key0 = jax.random.PRNGKey(0)
    keys = jax.random.split(key0, 12)
    scale = 1.0 / math.sqrt(D)

    # nn.Linear(d_model, d_model) weights, stored transposed as (D_in, D_out)
    params = {
        "wq": jax.random.normal(keys[0], (D, D), jnp.float32) * scale,
        "bq": jax.random.normal(keys[1], (1, D), jnp.float32) * scale,
        "wk": jax.random.normal(keys[2], (D, D), jnp.float32) * scale,
        "bk": jax.random.normal(keys[3], (1, D), jnp.float32) * scale,
        "wv": jax.random.normal(keys[4], (D, D), jnp.float32) * scale,
        "bv": jax.random.normal(keys[5], (1, D), jnp.float32) * scale,
        "wo": jax.random.normal(keys[6], (D, D), jnp.float32) * scale,
        "bo": jax.random.normal(keys[7], (1, D), jnp.float32) * scale,
    }

    query = jax.random.normal(keys[8], (B, S, D), jnp.float32)
    key_ = jax.random.normal(keys[9], (B, S, D), jnp.float32)
    value = jax.random.normal(keys[10], (B, S, D), jnp.float32)

    # padding mask: batch 1 masks out its last 2 key positions (PyTorch-style 0/1 mask)
    mask = np.ones((B, 1, S, S), dtype=np.float32)
    mask[1, :, :, -2:] = 0.0
    mask = jnp.asarray(mask)

    out = multi_head_attention(params, query, key_, value, mask, h=H)
    out = jax.block_until_ready(out)

    ref = reference_mha(params, query, key_, value, mask, h=H)
    np.testing.assert_allclose(np.asarray(out), np.asarray(ref), rtol=1e-4, atol=1e-4)

    print("KERNEL_OK")
</pallas_src>

<mosaic_0001>
module attributes {stable_mosaic.version = 11 : i64} {
  func.func @_mha_kernel(%arg0: i32, %arg1: memref<16x32xf32, #tpu.memory_space<vmem>>, %arg2: memref<16x32xf32, #tpu.memory_space<vmem>>, %arg3: memref<16x32xf32, #tpu.memory_space<vmem>>, %arg4: memref<2x8x8xf32, #tpu.memory_space<vmem>>, %arg5: memref<32x32xf32, #tpu.memory_space<vmem>>, %arg6: memref<32x32xf32, #tpu.memory_space<vmem>>, %arg7: memref<32x32xf32, #tpu.memory_space<vmem>>, %arg8: memref<32x32xf32, #tpu.memory_space<vmem>>, %arg9: memref<4x32xf32, #tpu.memory_space<vmem>>, %arg10: memref<16x32xf32, #tpu.memory_space<vmem>>, %arg11: memref<16x32xf32, #tpu.memory_space<vmem>>) attributes {dimension_semantics = [#tpu.dimension_semantics<arbitrary>], iteration_bounds = array<i64: 1>, scalar_prefetch = 0 : i64, scratch_operands = 1 : i64, tpu.core_type = #tpu.core_type<tc>, window_params = [{pipeline_mode = #tpu.pipeline_mode<synchronous>, transform_indices = @transform_0, window_bounds = array<i64: 16, 32>}, {pipeline_mode = #tpu.pipeline_mode<synchronous>, transform_indices = @transform_1, window_bounds = array<i64: 16, 32>}, {pipeline_mode = #tpu.pipeline_mode<synchronous>, transform_indices = @transform_2, window_bounds = array<i64: 16, 32>}, {pipeline_mode = #tpu.pipeline_mode<synchronous>, transform_indices = @transform_3, window_bounds = array<i64: 2, 8, 8>}, {pipeline_mode = #tpu.pipeline_mode<synchronous>, transform_indices = @transform_4, window_bounds = array<i64: 32, 32>}, {pipeline_mode = #tpu.pipeline_mode<synchronous>, transform_indices = @transform_5, window_bounds = array<i64: 32, 32>}, {pipeline_mode = #tpu.pipeline_mode<synchronous>, transform_indices = @transform_6, window_bounds = array<i64: 32, 32>}, {pipeline_mode = #tpu.pipeline_mode<synchronous>, transform_indices = @transform_7, window_bounds = array<i64: 32, 32>}, {pipeline_mode = #tpu.pipeline_mode<synchronous>, transform_indices = @transform_8, window_bounds = array<i64: 4, 32>}, {pipeline_mode = #tpu.pipeline_mode<synchronous>, transform_indices = @transform_9, window_bounds = array<i64: 16, 32>}]} {
    %c0 = arith.constant 0 : index
    %c0_0 = arith.constant 0 : index
    %0 = vector.load %arg9[%c0, %c0_0] : memref<4x32xf32, #tpu.memory_space<vmem>>, vector<4x32xf32>
    %1 = vector.extract_strided_slice %0 {offsets = [0, 0], sizes = [1, 32], strides = [1, 1]} : vector<4x32xf32> to vector<1x32xf32>
    %2 = vector.extract_strided_slice %0 {offsets = [1, 0], sizes = [1, 32], strides = [1, 1]} : vector<4x32xf32> to vector<1x32xf32>
    %3 = vector.extract_strided_slice %0 {offsets = [2, 0], sizes = [1, 32], strides = [1, 1]} : vector<4x32xf32> to vector<1x32xf32>
    %4 = vector.extract_strided_slice %0 {offsets = [3, 0], sizes = [1, 32], strides = [1, 1]} : vector<4x32xf32> to vector<1x32xf32>
    %c0_1 = arith.constant 0 : index
    %c0_2 = arith.constant 0 : index
    %5 = vector.load %arg1[%c0_1, %c0_2] : memref<16x32xf32, #tpu.memory_space<vmem>>, vector<16x32xf32>
    %c0_3 = arith.constant 0 : index
    %c0_4 = arith.constant 0 : index
    %6 = vector.load %arg5[%c0_3, %c0_4] : memref<32x32xf32, #tpu.memory_space<vmem>>, vector<32x32xf32>
    %cst = arith.constant dense<0.000000e+00> : vector<16x32xf32>
    %7 = tpu.matmul %5, %6, %cst {dimension_numbers = #tpu.dot_dimension_numbers<[1], [0], [0], [1], [0, 0, 1, 1], [], []>, precision = #tpu.contract_precision<fp32>} : vector<16x32xf32>, vector<32x32xf32>, vector<16x32xf32> -> vector<16x32xf32>
    %8 = vector.broadcast %1 : vector<1x32xf32> to vector<16x32xf32>
    %9 = arith.addf %7, %8 : vector<16x32xf32>
    %cst_5 = arith.constant 0.353553385 : f32
    %10 = vector.broadcast %cst_5 : f32 to vector<16x32xf32>
    %11 = arith.mulf %9, %10 : vector<16x32xf32>
    %c0_6 = arith.constant 0 : index
    %c0_7 = arith.constant 0 : index
    %12 = vector.load %arg2[%c0_6, %c0_7] : memref<16x32xf32, #tpu.memory_space<vmem>>, vector<16x32xf32>
    %c0_8 = arith.constant 0 : index
    %c0_9 = arith.constant 0 : index
    %13 = vector.load %arg6[%c0_8, %c0_9] : memref<32x32xf32, #tpu.memory_space<vmem>>, vector<32x32xf32>
    %cst_10 = arith.constant dense<0.000000e+00> : vector<16x32xf32>
    %14 = tpu.matmul %12, %13, %cst_10 {dimension_numbers = #tpu.dot_dimension_numbers<[1], [0], [0], [1], [0, 0, 1, 1], [], []>, precision = #tpu.contract_precision<fp32>} : vector<16x32xf32>, vector<32x32xf32>, vector<16x32xf32> -> vector<16x32xf32>
    %15 = vector.broadcast %2 : vector<1x32xf32> to vector<16x32xf32>
    %16 = arith.addf %14, %15 : vector<16x32xf32>
    %c0_11 = arith.constant 0 : index
    %c0_12 = arith.constant 0 : index
    %17 = vector.load %arg3[%c0_11, %c0_12] : memref<16x32xf32, #tpu.memory_space<vmem>>, vector<16x32xf32>
    %c0_13 = arith.constant 0 : index
    %c0_14 = arith.constant 0 : index
    %18 = vector.load %arg7[%c0_13, %c0_14] : memref<32x32xf32, #tpu.memory_space<vmem>>, vector<32x32xf32>
    %cst_15 = arith.constant dense<0.000000e+00> : vector<16x32xf32>
    %19 = tpu.matmul %17, %18, %cst_15 {dimension_numbers = #tpu.dot_dimension_numbers<[1], [0], [0], [1], [0, 0, 1, 1], [], []>, precision = #tpu.contract_precision<fp32>} : vector<16x32xf32>, vector<32x32xf32>, vector<16x32xf32> -> vector<16x32xf32>
    %20 = vector.broadcast %3 : vector<1x32xf32> to vector<16x32xf32>
    %21 = arith.addf %19, %20 : vector<16x32xf32>
    %c0_16 = arith.constant 0 : index
    %c0_17 = arith.constant 0 : index
    %c0_18 = arith.constant 0 : index
    %22 = vector.load %arg4[%c0_16, %c0_17, %c0_18] : memref<2x8x8xf32, #tpu.memory_space<vmem>>, vector<1x8x8xf32>
    %23 = vector.shape_cast %22 : vector<1x8x8xf32> to vector<8x8xf32>
    %cst_19 = arith.constant 0.000000e+00 : f32
    %24 = vector.broadcast %cst_19 : f32 to vector<8x8xf32>
    %25 = arith.cmpf oeq, %23, %24 : vector<8x8xf32>
    %cst_20 = arith.constant -1.000000e+09 : f32
    %cst_21 = arith.constant 0.000000e+00 : f32
    %26 = vector.broadcast %cst_20 : f32 to vector<8x8xf32>
    %27 = vector.broadcast %cst_21 : f32 to vector<8x8xf32>
    %28 = arith.select %25, %26, %27 : vector<8x8xi1>, vector<8x8xf32>
    %29 = vector.extract_strided_slice %11 {offsets = [0, 0], sizes = [8, 32], strides = [1, 1]} : vector<16x32xf32> to vector<8x32xf32>
    %30 = vector.extract_strided_slice %16 {offsets = [0, 0], sizes = [8, 32], strides = [1, 1]} : vector<16x32xf32> to vector<8x32xf32>
    %31 = vector.extract_strided_slice %21 {offsets = [0, 0], sizes = [8, 32], strides = [1, 1]} : vector<16x32xf32> to vector<8x32xf32>
    %32 = vector.extract_strided_slice %29 {offsets = [0, 0], sizes = [8, 8], strides = [1, 1]} : vector<8x32xf32> to vector<8x8xf32>
    %33 = vector.extract_strided_slice %30 {offsets = [0, 0], sizes = [8, 8], strides = [1, 1]} : vector<8x32xf32> to vector<8x8xf32>
    %34 = vector.extract_strided_slice %31 {offsets = [0, 0], sizes = [8, 8], strides = [1, 1]} : vector<8x32xf32> to vector<8x8xf32>
    %cst_22 = arith.constant dense<0.000000e+00> : vector<8x8xf32>
    %35 = tpu.matmul %32, %33, %cst_22 {dimension_numbers = #tpu.dot_dimension_numbers<[1], [1], [0], [0], [0, 0, 1, 0], [], []>, precision = #tpu.contract_precision<fp32>} : vector<8x8xf32>, vector<8x8xf32>, vector<8x8xf32> -> vector<8x8xf32>
    %36 = arith.addf %35, %28 : vector<8x8xf32>
    %cst_23 = arith.constant dense<0xFF800000> : vector<8xf32>
    %37 = vector.multi_reduction <maximumf>, %36, %cst_23 [1] : vector<8x8xf32> to vector<8xf32>
    %38 = vector.shape_cast %37 : vector<8xf32> to vector<8x1xf32>
    %39 = vector.broadcast %38 : vector<8x1xf32> to vector<8x8xf32>
    %40 = arith.subf %36, %39 : vector<8x8xf32>
    %41 = math.exp %40 : vector<8x8xf32>
    %cst_24 = arith.constant dense<0.000000e+00> : vector<8xf32>
    %42 = vector.multi_reduction <add>, %41, %cst_24 [1] : vector<8x8xf32> to vector<8xf32>
    %43 = vector.shape_cast %42 : vector<8xf32> to vector<8x1xf32>
    %cst_25 = arith.constant dense<0.000000e+00> : vector<8x8xf32>
    %44 = tpu.matmul %41, %34, %cst_25 {dimension_numbers = #tpu.dot_dimension_numbers<[1], [0], [0], [1], [0, 0, 1, 1], [], []>, precision = #tpu.contract_precision<fp32>} : vector<8x8xf32>, vector<8x8xf32>, vector<8x8xf32> -> vector<8x8xf32>
    %45 = vector.broadcast %43 : vector<8x1xf32> to vector<8x8xf32>
    %46 = arith.divf %44, %45 : vector<8x8xf32>
    %c0_26 = arith.constant 0 : index
    %c0_27 = arith.constant 0 : index
    %47 = vector.load %arg11[%c0_26, %c0_27] : memref<16x32xf32, #tpu.memory_space<vmem>>, vector<8x8xf32>
    tpu.vector_store %arg11[%c0_26, %c0_27], %46 {strides = array<i32>} : memref<16x32xf32, #tpu.memory_space<vmem>>, vector<8x8xf32>,
    %48 = vector.extract_strided_slice %29 {offsets = [0, 8], sizes = [8, 8], strides = [1, 1]} : vector<8x32xf32> to vector<8x8xf32>
    %49 = vector.extract_strided_slice %30 {offsets = [0, 8], sizes = [8, 8], strides = [1, 1]} : vector<8x32xf32> to vector<8x8xf32>
    %50 = vector.extract_strided_slice %31 {offsets = [0, 8], sizes = [8, 8], strides = [1, 1]} : vector<8x32xf32> to vector<8x8xf32>
    %cst_28 = arith.constant dense<0.000000e+00> : vector<8x8xf32>
    %51 = tpu.matmul %48, %49, %cst_28 {dimension_numbers = #tpu.dot_dimension_numbers<[1], [1], [0], [0], [0, 0, 1, 0], [], []>, precision = #tpu.contract_precision<fp32>} : vector<8x8xf32>, vector<8x8xf32>, vector<8x8xf32> -> vector<8x8xf32>
    %52 = arith.addf %51, %28 : vector<8x8xf32>
    %cst_29 = arith.constant dense<0xFF800000> : vector<8xf32>
    %53 = vector.multi_reduction <maximumf>, %52, %cst_29 [1] : vector<8x8xf32> to vector<8xf32>
    %54 = vector.shape_cast %53 : vector<8xf32> to vector<8x1xf32>
    %55 = vector.broadcast %54 : vector<8x1xf32> to vector<8x8xf32>
    %56 = arith.subf %52, %55 : vector<8x8xf32>
    %57 = math.exp %56 : vector<8x8xf32>
    %cst_30 = arith.constant dense<0.000000e+00> : vector<8xf32>
    %58 = vector.multi_reduction <add>, %57, %cst_30 [1] : vector<8x8xf32> to vector<8xf32>
    %59 = vector.shape_cast %58 : vector<8xf32> to vector<8x1xf32>
    %cst_31 = arith.constant dense<0.000000e+00> : vector<8x8xf32>
    %60 = tpu.matmul %57, %50, %cst_31 {dimension_numbers = #tpu.dot_dimension_numbers<[1], [0], [0], [1], [0, 0, 1, 1], [], []>, precision = #tpu.contract_precision<fp32>} : vector<8x8xf32>, vector<8x8xf32>, vector<8x8xf32> -> vector<8x8xf32>
    %61 = vector.broadcast %59 : vector<8x1xf32> to vector<8x8xf32>
    %62 = arith.divf %60, %61 : vector<8x8xf32>
    %c0_32 = arith.constant 0 : index
    %c8 = arith.constant 8 : index
    %63 = vector.load %arg11[%c0_32, %c8] : memref<16x32xf32, #tpu.memory_space<vmem>>, vector<8x8xf32>
    tpu.vector_store %arg11[%c0_32, %c8], %62 {strides = array<i32>} : memref<16x32xf32, #tpu.memory_space<vmem>>, vector<8x8xf32>,
    %64 = vector.extract_strided_slice %29 {offsets = [0, 16], sizes = [8, 8], strides = [1, 1]} : vector<8x32xf32> to vector<8x8xf32>
    %65 = vector.extract_strided_slice %30 {offsets = [0, 16], sizes = [8, 8], strides = [1, 1]} : vector<8x32xf32> to vector<8x8xf32>
    %66 = vector.extract_strided_slice %31 {offsets = [0, 16], sizes = [8, 8], strides = [1, 1]} : vector<8x32xf32> to vector<8x8xf32>
    %cst_33 = arith.constant dense<0.000000e+00> : vector<8x8xf32>
    %67 = tpu.matmul %64, %65, %cst_33 {dimension_numbers = #tpu.dot_dimension_numbers<[1], [1], [0], [0], [0, 0, 1, 0], [], []>, precision = #tpu.contract_precision<fp32>} : vector<8x8xf32>, vector<8x8xf32>, vector<8x8xf32> -> vector<8x8xf32>
    %68 = arith.addf %67, %28 : vector<8x8xf32>
    %cst_34 = arith.constant dense<0xFF800000> : vector<8xf32>
    %69 = vector.multi_reduction <maximumf>, %68, %cst_34 [1] : vector<8x8xf32> to vector<8xf32>
    %70 = vector.shape_cast %69 : vector<8xf32> to vector<8x1xf32>
    %71 = vector.broadcast %70 : vector<8x1xf32> to vector<8x8xf32>
    %72 = arith.subf %68, %71 : vector<8x8xf32>
    %73 = math.exp %72 : vector<8x8xf32>
    %cst_35 = arith.constant dense<0.000000e+00> : vector<8xf32>
    %74 = vector.multi_reduction <add>, %73, %cst_35 [1] : vector<8x8xf32> to vector<8xf32>
    %75 = vector.shape_cast %74 : vector<8xf32> to vector<8x1xf32>
    %cst_36 = arith.constant dense<0.000000e+00> : vector<8x8xf32>
    %76 = tpu.matmul %73, %66, %cst_36 {dimension_numbers = #tpu.dot_dimension_numbers<[1], [0], [0], [1], [0, 0, 1, 1], [], []>, precision = #tpu.contract_precision<fp32>} : vector<8x8xf32>, vector<8x8xf32>, vector<8x8xf32> -> vector<8x8xf32>
    %77 = vector.broadcast %75 : vector<8x1xf32> to vector<8x8xf32>
    %78 = arith.divf %76, %77 : vector<8x8xf32>
    %c0_37 = arith.constant 0 : index
    %c16 = arith.constant 16 : index
    %79 = vector.load %arg11[%c0_37, %c16] : memref<16x32xf32, #tpu.memory_space<vmem>>, vector<8x8xf32>
    tpu.vector_store %arg11[%c0_37, %c16], %78 {strides = array<i32>} : memref<16x32xf32, #tpu.memory_space<vmem>>, vector<8x8xf32>,
    %80 = vector.extract_strided_slice %29 {offsets = [0, 24], sizes = [8, 8], strides = [1, 1]} : vector<8x32xf32> to vector<8x8xf32>
    %81 = vector.extract_strided_slice %30 {offsets = [0, 24], sizes = [8, 8], strides = [1, 1]} : vector<8x32xf32> to vector<8x8xf32>
    %82 = vector.extract_strided_slice %31 {offsets = [0, 24], sizes = [8, 8], strides = [1, 1]} : vector<8x32xf32> to vector<8x8xf32>
    %cst_38 = arith.constant dense<0.000000e+00> : vector<8x8xf32>
    %83 = tpu.matmul %80, %81, %cst_38 {dimension_numbers = #tpu.dot_dimension_numbers<[1], [1], [0], [0], [0, 0, 1, 0], [], []>, precision = #tpu.contract_precision<fp32>} : vector<8x8xf32>, vector<8x8xf32>, vector<8x8xf32> -> vector<8x8xf32>
    %84 = arith.addf %83, %28 : vector<8x8xf32>
    %cst_39 = arith.constant dense<0xFF800000> : vector<8xf32>
    %85 = vector.multi_reduction <maximumf>, %84, %cst_39 [1] : vector<8x8xf32> to vector<8xf32>
    %86 = vector.shape_cast %85 : vector<8xf32> to vector<8x1xf32>
    %87 = vector.broadcast %86 : vector<8x1xf32> to vector<8x8xf32>
    %88 = arith.subf %84, %87 : vector<8x8xf32>
    %89 = math.exp %88 : vector<8x8xf32>
    %cst_40 = arith.constant dense<0.000000e+00> : vector<8xf32>
    %90 = vector.multi_reduction <add>, %89, %cst_40 [1] : vector<8x8xf32> to vector<8xf32>
    %91 = vector.shape_cast %90 : vector<8xf32> to vector<8x1xf32>
    %cst_41 = arith.constant dense<0.000000e+00> : vector<8x8xf32>
    %92 = tpu.matmul %89, %82, %cst_41 {dimension_numbers = #tpu.dot_dimension_numbers<[1], [0], [0], [1], [0, 0, 1, 1], [], []>, precision = #tpu.contract_precision<fp32>} : vector<8x8xf32>, vector<8x8xf32>, vector<8x8xf32> -> vector<8x8xf32>
    %93 = vector.broadcast %91 : vector<8x1xf32> to vector<8x8xf32>
    %94 = arith.divf %92, %93 : vector<8x8xf32>
    %c0_42 = arith.constant 0 : index
    %c24 = arith.constant 24 : index
    %95 = vector.load %arg11[%c0_42, %c24] : memref<16x32xf32, #tpu.memory_space<vmem>>, vector<8x8xf32>
    tpu.vector_store %arg11[%c0_42, %c24], %94 {strides = array<i32>} : memref<16x32xf32, #tpu.memory_space<vmem>>, vector<8x8xf32>,
    %c1 = arith.constant 1 : index
    %c0_43 = arith.constant 0 : index
    %c0_44 = arith.constant 0 : index
    %96 = vector.load %arg4[%c1, %c0_43, %c0_44] : memref<2x8x8xf32, #tpu.memory_space<vmem>>, vector<1x8x8xf32>
    %97 = vector.shape_cast %96 : vector<1x8x8xf32> to vector<8x8xf32>
    %cst_45 = arith.constant 0.000000e+00 : f32
    %98 = vector.broadcast %cst_45 : f32 to vector<8x8xf32>
    %99 = arith.cmpf oeq, %97, %98 : vector<8x8xf32>
    %cst_46 = arith.constant -1.000000e+09 : f32
    %cst_47 = arith.constant 0.000000e+00 : f32
    %100 = vector.broadcast %cst_46 : f32 to vector<8x8xf32>
    %101 = vector.broadcast %cst_47 : f32 to vector<8x8xf32>
    %102 = arith.select %99, %100, %101 : vector<8x8xi1>, vector<8x8xf32>
    %103 = vector.extract_strided_slice %11 {offsets = [8, 0], sizes = [8, 32], strides = [1, 1]} : vector<16x32xf32> to vector<8x32xf32>
    %104 = vector.extract_strided_slice %16 {offsets = [8, 0], sizes = [8, 32], strides = [1, 1]} : vector<16x32xf32> to vector<8x32xf32>
    %105 = vector.extract_strided_slice %21 {offsets = [8, 0], sizes = [8, 32], strides = [1, 1]} : vector<16x32xf32> to vector<8x32xf32>
    %106 = vector.extract_strided_slice %103 {offsets = [0, 0], sizes = [8, 8], strides = [1, 1]} : vector<8x32xf32> to vector<8x8xf32>
    %107 = vector.extract_strided_slice %104 {offsets = [0, 0], sizes = [8, 8], strides = [1, 1]} : vector<8x32xf32> to vector<8x8xf32>
    %108 = vector.extract_strided_slice %105 {offsets = [0, 0], sizes = [8, 8], strides = [1, 1]} : vector<8x32xf32> to vector<8x8xf32>
    %cst_48 = arith.constant dense<0.000000e+00> : vector<8x8xf32>
    %109 = tpu.matmul %106, %107, %cst_48 {dimension_numbers = #tpu.dot_dimension_numbers<[1], [1], [0], [0], [0, 0, 1, 0], [], []>, precision = #tpu.contract_precision<fp32>} : vector<8x8xf32>, vector<8x8xf32>, vector<8x8xf32> -> vector<8x8xf32>
    %110 = arith.addf %109, %102 : vector<8x8xf32>
    %cst_49 = arith.constant dense<0xFF800000> : vector<8xf32>
    %111 = vector.multi_reduction <maximumf>, %110, %cst_49 [1] : vector<8x8xf32> to vector<8xf32>
    %112 = vector.shape_cast %111 : vector<8xf32> to vector<8x1xf32>
    %113 = vector.broadcast %112 : vector<8x1xf32> to vector<8x8xf32>
    %114 = arith.subf %110, %113 : vector<8x8xf32>
    %115 = math.exp %114 : vector<8x8xf32>
    %cst_50 = arith.constant dense<0.000000e+00> : vector<8xf32>
    %116 = vector.multi_reduction <add>, %115, %cst_50 [1] : vector<8x8xf32> to vector<8xf32>
    %117 = vector.shape_cast %116 : vector<8xf32> to vector<8x1xf32>
    %cst_51 = arith.constant dense<0.000000e+00> : vector<8x8xf32>
    %118 = tpu.matmul %115, %108, %cst_51 {dimension_numbers = #tpu.dot_dimension_numbers<[1], [0], [0], [1], [0, 0, 1, 1], [], []>, precision = #tpu.contract_precision<fp32>} : vector<8x8xf32>, vector<8x8xf32>, vector<8x8xf32> -> vector<8x8xf32>
    %119 = vector.broadcast %117 : vector<8x1xf32> to vector<8x8xf32>
    %120 = arith.divf %118, %119 : vector<8x8xf32>
    %c8_52 = arith.constant 8 : index
    %c0_53 = arith.constant 0 : index
    %121 = vector.load %arg11[%c8_52, %c0_53] : memref<16x32xf32, #tpu.memory_space<vmem>>, vector<8x8xf32>
    tpu.vector_store %arg11[%c8_52, %c0_53], %120 {strides = array<i32>} : memref<16x32xf32, #tpu.memory_space<vmem>>, vector<8x8xf32>,
    %122 = vector.extract_strided_slice %103 {offsets = [0, 8], sizes = [8, 8], strides = [1, 1]} : vector<8x32xf32> to vector<8x8xf32>
    %123 = vector.extract_strided_slice %104 {offsets = [0, 8], sizes = [8, 8], strides = [1, 1]} : vector<8x32xf32> to vector<8x8xf32>
    %124 = vector.extract_strided_slice %105 {offsets = [0, 8], sizes = [8, 8], strides = [1, 1]} : vector<8x32xf32> to vector<8x8xf32>
    %cst_54 = arith.constant dense<0.000000e+00> : vector<8x8xf32>
    %125 = tpu.matmul %122, %123, %cst_54 {dimension_numbers = #tpu.dot_dimension_numbers<[1], [1], [0], [0], [0, 0, 1, 0], [], []>, precision = #tpu.contract_precision<fp32>} : vector<8x8xf32>, vector<8x8xf32>, vector<8x8xf32> -> vector<8x8xf32>
    %126 = arith.addf %125, %102 : vector<8x8xf32>
    %cst_55 = arith.constant dense<0xFF800000> : vector<8xf32>
    %127 = vector.multi_reduction <maximumf>, %126, %cst_55 [1] : vector<8x8xf32> to vector<8xf32>
    %128 = vector.shape_cast %127 : vector<8xf32> to vector<8x1xf32>
    %129 = vector.broadcast %128 : vector<8x1xf32> to vector<8x8xf32>
    %130 = arith.subf %126, %129 : vector<8x8xf32>
    %131 = math.exp %130 : vector<8x8xf32>
    %cst_56 = arith.constant dense<0.000000e+00> : vector<8xf32>
    %132 = vector.multi_reduction <add>, %131, %cst_56 [1] : vector<8x8xf32> to vector<8xf32>
    %133 = vector.shape_cast %132 : vector<8xf32> to vector<8x1xf32>
    %cst_57 = arith.constant dense<0.000000e+00> : vector<8x8xf32>
    %134 = tpu.matmul %131, %124, %cst_57 {dimension_numbers = #tpu.dot_dimension_numbers<[1], [0], [0], [1], [0, 0, 1, 1], [], []>, precision = #tpu.contract_precision<fp32>} : vector<8x8xf32>, vector<8x8xf32>, vector<8x8xf32> -> vector<8x8xf32>
    %135 = vector.broadcast %133 : vector<8x1xf32> to vector<8x8xf32>
    %136 = arith.divf %134, %135 : vector<8x8xf32>
    %c8_58 = arith.constant 8 : index
    %c8_59 = arith.constant 8 : index
    %137 = vector.load %arg11[%c8_58, %c8_59] : memref<16x32xf32, #tpu.memory_space<vmem>>, vector<8x8xf32>
    tpu.vector_store %arg11[%c8_58, %c8_59], %136 {strides = array<i32>} : memref<16x32xf32, #tpu.memory_space<vmem>>, vector<8x8xf32>,
    %138 = vector.extract_strided_slice %103 {offsets = [0, 16], sizes = [8, 8], strides = [1, 1]} : vector<8x32xf32> to vector<8x8xf32>
    %139 = vector.extract_strided_slice %104 {offsets = [0, 16], sizes = [8, 8], strides = [1, 1]} : vector<8x32xf32> to vector<8x8xf32>
    %140 = vector.extract_strided_slice %105 {offsets = [0, 16], sizes = [8, 8], strides = [1, 1]} : vector<8x32xf32> to vector<8x8xf32>
    %cst_60 = arith.constant dense<0.000000e+00> : vector<8x8xf32>
    %141 = tpu.matmul %138, %139, %cst_60 {dimension_numbers = #tpu.dot_dimension_numbers<[1], [1], [0], [0], [0, 0, 1, 0], [], []>, precision = #tpu.contract_precision<fp32>} : vector<8x8xf32>, vector<8x8xf32>, vector<8x8xf32> -> vector<8x8xf32>
    %142 = arith.addf %141, %102 : vector<8x8xf32>
    %cst_61 = arith.constant dense<0xFF800000> : vector<8xf32>
    %143 = vector.multi_reduction <maximumf>, %142, %cst_61 [1] : vector<8x8xf32> to vector<8xf32>
    %144 = vector.shape_cast %143 : vector<8xf32> to vector<8x1xf32>
    %145 = vector.broadcast %144 : vector<8x1xf32> to vector<8x8xf32>
    %146 = arith.subf %142, %145 : vector<8x8xf32>
    %147 = math.exp %146 : vector<8x8xf32>
    %cst_62 = arith.constant dense<0.000000e+00> : vector<8xf32>
    %148 = vector.multi_reduction <add>, %147, %cst_62 [1] : vector<8x8xf32> to vector<8xf32>
    %149 = vector.shape_cast %148 : vector<8xf32> to vector<8x1xf32>
    %cst_63 = arith.constant dense<0.000000e+00> : vector<8x8xf32>
    %150 = tpu.matmul %147, %140, %cst_63 {dimension_numbers = #tpu.dot_dimension_numbers<[1], [0], [0], [1], [0, 0, 1, 1], [], []>, precision = #tpu.contract_precision<fp32>} : vector<8x8xf32>, vector<8x8xf32>, vector<8x8xf32> -> vector<8x8xf32>
    %151 = vector.broadcast %149 : vector<8x1xf32> to vector<8x8xf32>
    %152 = arith.divf %150, %151 : vector<8x8xf32>
    %c8_64 = arith.constant 8 : index
    %c16_65 = arith.constant 16 : index
    %153 = vector.load %arg11[%c8_64, %c16_65] : memref<16x32xf32, #tpu.memory_space<vmem>>, vector<8x8xf32>
    tpu.vector_store %arg11[%c8_64, %c16_65], %152 {strides = array<i32>} : memref<16x32xf32, #tpu.memory_space<vmem>>, vector<8x8xf32>,
    %154 = vector.extract_strided_slice %103 {offsets = [0, 24], sizes = [8, 8], strides = [1, 1]} : vector<8x32xf32> to vector<8x8xf32>
    %155 = vector.extract_strided_slice %104 {offsets = [0, 24], sizes = [8, 8], strides = [1, 1]} : vector<8x32xf32> to vector<8x8xf32>
    %156 = vector.extract_strided_slice %105 {offsets = [0, 24], sizes = [8, 8], strides = [1, 1]} : vector<8x32xf32> to vector<8x8xf32>
    %cst_66 = arith.constant dense<0.000000e+00> : vector<8x8xf32>
    %157 = tpu.matmul %154, %155, %cst_66 {dimension_numbers = #tpu.dot_dimension_numbers<[1], [1], [0], [0], [0, 0, 1, 0], [], []>, precision = #tpu.contract_precision<fp32>} : vector<8x8xf32>, vector<8x8xf32>, vector<8x8xf32> -> vector<8x8xf32>
    %158 = arith.addf %157, %102 : vector<8x8xf32>
    %cst_67 = arith.constant dense<0xFF800000> : vector<8xf32>
    %159 = vector.multi_reduction <maximumf>, %158, %cst_67 [1] : vector<8x8xf32> to vector<8xf32>
    %160 = vector.shape_cast %159 : vector<8xf32> to vector<8x1xf32>
    %161 = vector.broadcast %160 : vector<8x1xf32> to vector<8x8xf32>
    %162 = arith.subf %158, %161 : vector<8x8xf32>
    %163 = math.exp %162 : vector<8x8xf32>
    %cst_68 = arith.constant dense<0.000000e+00> : vector<8xf32>
    %164 = vector.multi_reduction <add>, %163, %cst_68 [1] : vector<8x8xf32> to vector<8xf32>
    %165 = vector.shape_cast %164 : vector<8xf32> to vector<8x1xf32>
    %cst_69 = arith.constant dense<0.000000e+00> : vector<8x8xf32>
    %166 = tpu.matmul %163, %156, %cst_69 {dimension_numbers = #tpu.dot_dimension_numbers<[1], [0], [0], [1], [0, 0, 1, 1], [], []>, precision = #tpu.contract_precision<fp32>} : vector<8x8xf32>, vector<8x8xf32>, vector<8x8xf32> -> vector<8x8xf32>
    %167 = vector.broadcast %165 : vector<8x1xf32> to vector<8x8xf32>
    %168 = arith.divf %166, %167 : vector<8x8xf32>
    %c8_70 = arith.constant 8 : index
    %c24_71 = arith.constant 24 : index
    %169 = vector.load %arg11[%c8_70, %c24_71] : memref<16x32xf32, #tpu.memory_space<vmem>>, vector<8x8xf32>
    tpu.vector_store %arg11[%c8_70, %c24_71], %168 {strides = array<i32>} : memref<16x32xf32, #tpu.memory_space<vmem>>, vector<8x8xf32>,
    %c0_72 = arith.constant 0 : index
    %c0_73 = arith.constant 0 : index
    %170 = vector.load %arg11[%c0_72, %c0_73] : memref<16x32xf32, #tpu.memory_space<vmem>>, vector<16x32xf32>
    %c0_74 = arith.constant 0 : index
    %c0_75 = arith.constant 0 : index
    %171 = vector.load %arg8[%c0_74, %c0_75] : memref<32x32xf32, #tpu.memory_space<vmem>>, vector<32x32xf32>
    %cst_76 = arith.constant dense<0.000000e+00> : vector<16x32xf32>
    %172 = tpu.matmul %170, %171, %cst_76 {dimension_numbers = #tpu.dot_dimension_numbers<[1], [0], [0], [1], [0, 0, 1, 1], [], []>, precision = #tpu.contract_precision<fp32>} : vector<16x32xf32>, vector<32x32xf32>, vector<16x32xf32> -> vector<16x32xf32>
    %173 = vector.broadcast %4 : vector<1x32xf32> to vector<16x32xf32>
    %174 = arith.addf %172, %173 : vector<16x32xf32>
    %c0_77 = arith.constant 0 : index
    %c0_78 = arith.constant 0 : index
    %175 = vector.load %arg10[%c0_77, %c0_78] : memref<16x32xf32, #tpu.memory_space<vmem>>, vector<16x32xf32>
    tpu.vector_store %arg10[%c0_77, %c0_78], %174 {strides = array<i32>} : memref<16x32xf32, #tpu.memory_space<vmem>>, vector<16x32xf32>,
    return
  }
  func.func @transform_0(%arg0: i32) -> (i32, i32) {
    %c0_i32 = arith.constant 0 : i32
    %c0_i32_0 = arith.constant 0 : i32
    %c0_i32_1 = arith.constant 0 : i32
    return %c0_i32, %c0_i32_0 : i32, i32
  }
  func.func @transform_1(%arg0: i32) -> (i32, i32) {
    %c0_i32 = arith.constant 0 : i32
    %c0_i32_0 = arith.constant 0 : i32
    %c0_i32_1 = arith.constant 0 : i32
    return %c0_i32, %c0_i32_0 : i32, i32
  }
  func.func @transform_2(%arg0: i32) -> (i32, i32) {
    %c0_i32 = arith.constant 0 : i32
    %c0_i32_0 = arith.constant 0 : i32
    %c0_i32_1 = arith.constant 0 : i32
    return %c0_i32, %c0_i32_0 : i32, i32
  }
  func.func @transform_3(%arg0: i32) -> (i32, i32, i32) {
    %c0_i32 = arith.constant 0 : i32
    %c0_i32_0 = arith.constant 0 : i32
    %c0_i32_1 = arith.constant 0 : i32
    %c0_i32_2 = arith.constant 0 : i32
    return %c0_i32, %c0_i32_0, %c0_i32_1 : i32, i32, i32
  }
  func.func @transform_4(%arg0: i32) -> (i32, i32) {
    %c0_i32 = arith.constant 0 : i32
    %c0_i32_0 = arith.constant 0 : i32
    %c0_i32_1 = arith.constant 0 : i32
    return %c0_i32, %c0_i32_0 : i32, i32
  }
  func.func @transform_5(%arg0: i32) -> (i32, i32) {
    %c0_i32 = arith.constant 0 : i32
    %c0_i32_0 = arith.constant 0 : i32
    %c0_i32_1 = arith.constant 0 : i32
    return %c0_i32, %c0_i32_0 : i32, i32
  }
  func.func @transform_6(%arg0: i32) -> (i32, i32) {
    %c0_i32 = arith.constant 0 : i32
    %c0_i32_0 = arith.constant 0 : i32
    %c0_i32_1 = arith.constant 0 : i32
    return %c0_i32, %c0_i32_0 : i32, i32
  }
  func.func @transform_7(%arg0: i32) -> (i32, i32) {
    %c0_i32 = arith.constant 0 : i32
    %c0_i32_0 = arith.constant 0 : i32
    %c0_i32_1 = arith.constant 0 : i32
    return %c0_i32, %c0_i32_0 : i32, i32
  }
  func.func @transform_8(%arg0: i32) -> (i32, i32) {
    %c0_i32 = arith.constant 0 : i32
    %c0_i32_0 = arith.constant 0 : i32
    %c0_i32_1 = arith.constant 0 : i32
    return %c0_i32, %c0_i32_0 : i32, i32
  }
  func.func @transform_9(%arg0: i32) -> (i32, i32) {
    %c0_i32 = arith.constant 0 : i32
    %c0_i32_0 = arith.constant 0 : i32
    %c0_i32_1 = arith.constant 0 : i32
    return %c0_i32, %c0_i32_0 : i32, i32
  }
}

</mosaic_0001>

<bundles_post_ra>
// kernel: tpu_custom_call.1
= control target key start
LH: loop header
LB: loop body
LE: loop exit
PB: predicated region body
PF: predicated region fallthrough
CT: control target
= control target key end

     0   :  { %14 = vsyncpa [#allocation4], 0  ;;  %s12114_s0 = inlined_call_operand.hbm [shape: f32[16,32], index: 0, kind: input, shape index: {}]   ;;  %s12115_s1 = inlined_call_operand.hbm [shape: f32[16,32], index: 1, kind: input, shape index: {}]   ;;  %s12116_s2 = inlined_call_operand.hbm [shape: f32[16,32], index: 2, kind: input, shape index: {}]   ;;  %s12117_s3 = inlined_call_operand.hbm [shape: f32[2,8,8], index: 3, kind: input, shape index: {}]   ;;  %s12118_s4 = inlined_call_operand.hbm [shape: f32[32,32], index: 4, kind: input, shape index: {}]   ;;  %s12119_s5 = inlined_call_operand.hbm [shape: f32[32,32], index: 5, kind: input, shape index: {}]   ;;  %s12120_s6 = inlined_call_operand.hbm [shape: f32[32,32], index: 6, kind: input, shape index: {}]   ;;  %s12121_s7 = inlined_call_operand.hbm [shape: f32[32,32], index: 7, kind: input, shape index: {}]   ;;  %s12122_s8 = inlined_call_operand.vmem [shape: f32[4,32], index: 8, kind: input, shape index: {}]   ;;  %s12123_s9 = inlined_call_operand.hbm [shape: f32[16,32], index: 9, kind: output, shape index: {}]  }
   0x1   :  { %15 = vsyncpa [#allocation7], 0 }
   0x2   :  { %16 = vsyncpa [#allocation10], 0 }
   0x3   :  { %17 = vsyncpa [#allocation13], 0 }
   0x4   :  { %18 = vsyncpa [#allocation16], 0 }
   0x5   :  { %19 = vsyncpa [#allocation5], 0  ;;  %s11039_s30 = smov [#allocation6]   ;;  %s11040_s11 = smov [#allocation9]  }
   0x6   :  { %s37_s10 = sshll.u32 %s11039_s30, 4  ;;  %s61_s12 = sshll.u32 %s11040_s11, 4  ;;  %s38_s10 = int_to_ptr.vmem [resolvable:$true] %s37_s10  ;;  %s62_s12 = int_to_ptr.vmem [resolvable:$true] %s61_s12 }
   0x7   :  { %s10855_s13 = scalar_lea.vmem %s38_s10, 256  ;;  %p10860_p1 = scmp.lt.s32.totalorder %s38_s10, %s38_s10 }
   0x8   :  { %p10856_p0 = scmp.ne.s32.totalorder %s38_s10, %s10855_s13  ;;  %p10861_p2 = scmp.lt.s32.totalorder %s10855_s13, %s10855_s13 }
   0xa   :  { %p10862_p3 = por %p10861_p2, %p10860_p1 }
   0xc   :  { %p10863_p4 = pnand %p10862_p3, %p10856_p0 }
   0xe   :  { %10866 = shalt.err (!%p10863_p4)
}
   0xf   :  { %s11041_s14 = smov 128   ;;  %s11042_s15 = smov 8  }
  0x10   :  { %43 = dma.hbm_to_vmem [thread:$0]  %s12115_s1, 256, %s38_s10, [#allocation7], %s11041_s14, %s11041_s14, %s11042_s15  }
  0x11   :  { %s10875_s18 = scalar_lea.vmem %s62_s12, 256  ;;  %p10880_p6 = scmp.lt.s32.totalorder %s62_s12, %s62_s12 }
  0x12   :  { %p10876_p5 = scmp.ne.s32.totalorder %s62_s12, %s10875_s18  ;;  %p10881_p7 = scmp.lt.s32.totalorder %s10875_s18, %s10875_s18 }
  0x14   :  { %p10882_p8 = por %p10881_p7, %p10880_p6 }
  0x16   :  { %p10883_p9 = pnand %p10882_p8, %p10876_p5 }
  0x18   :  { %10886 = shalt.err (!%p10883_p9)
}
  0x19   :  { %67 = dma.hbm_to_vmem [thread:$0]  %s12117_s3, 256, %s62_s12, [#allocation10], %s11041_s14, %s11041_s14, %s11042_s15  }
  0x1a   :  { %s11043_s21 = smov [#allocation12]   ;;  %s11044_s23 = smov [#allocation3]  }
  0x1b   :  { %s85_s22 = sshll.u32 %s11043_s21, 4  ;;  %s25_s24 = sshll.u32 %s11044_s23, 4  ;;  %s86_s22 = int_to_ptr.vmem [resolvable:$true] %s85_s22  ;;  %s26_s24 = int_to_ptr.vmem [resolvable:$true] %s25_s24 }
  0x1c   :  { %s10895_s1 = scalar_lea.vmem %s86_s22, 512  ;;  %p10900_p11 = scmp.lt.s32.totalorder %s86_s22, %s86_s22 }
  0x1d   :  { %p10896_p10 = scmp.ne.s32.totalorder %s86_s22, %s10895_s1  ;;  %p10901_p12 = scmp.lt.s32.totalorder %s10895_s1, %s10895_s1 }
  0x1f   :  { %p10902_p13 = por %p10901_p12, %p10900_p11 }
  0x21   :  { %p10903_p0 = pnand %p10902_p13, %p10896_p10 }
  0x23   :  { %10906 = shalt.err (!%p10903_p0)
}
  0x24   :  { %91 = dma.hbm_to_vmem [thread:$0]  %s12119_s5, 512, %s86_s22, [#allocation13], %s11041_s14, %s11041_s14, %s11042_s15  }
  0x25   :  { %s10915_s3 = scalar_lea.vmem %s26_s24, 256  ;;  %p10920_p2 = scmp.lt.s32.totalorder %s26_s24, %s26_s24 }
  0x26   :  { %p10916_p1 = scmp.ne.s32.totalorder %s26_s24, %s10915_s3  ;;  %p10921_p3 = scmp.lt.s32.totalorder %s10915_s3, %s10915_s3 }
  0x28   :  { %p10922_p4 = por %p10921_p3, %p10920_p2 }
  0x2a   :  { %p10923_p5 = pnand %p10922_p4, %p10916_p1 }
  0x2c   :  { %10926 = shalt.err (!%p10923_p5)
}
  0x2d   :  { %31 = dma.hbm_to_vmem [thread:$0]  %s12114_s0, 256, %s26_s24, [#allocation4], %s11041_s14, %s11041_s14, %s11042_s15  }
  0x2e   :  { %s11045_s29 = smov [#allocation8]   ;;  %s11046_s10 = smov [#allocation11]  }
  0x2f   :  { %s49_s30 = sshll.u32 %s11045_s29, 4  ;;  %s73_s11 = sshll.u32 %s11046_s10, 4  ;;  %s50_s30 = int_to_ptr.vmem [resolvable:$true] %s49_s30  ;;  %s74_s11 = int_to_ptr.vmem [resolvable:$true] %s73_s11 }
  0x30   :  { %s10935_s5 = scalar_lea.vmem %s50_s30, 256  ;;  %p10940_p7 = scmp.lt.s32.totalorder %s50_s30, %s50_s30 }
  0x31   :  { %p10936_p6 = scmp.ne.s32.totalorder %s50_s30, %s10935_s5  ;;  %p10941_p8 = scmp.lt.s32.totalorder %s10935_s5, %s10935_s5 }
  0x33   :  { %p10942_p9 = por %p10941_p8, %p10940_p7 }
  0x35   :  { %p10943_p10 = pnand %p10942_p9, %p10936_p6 }
  0x37   :  { %10946 = shalt.err (!%p10943_p10)
}
  0x38   :  { %55 = dma.hbm_to_vmem [thread:$0]  %s12116_s2, 256, %s50_s30, [#allocation7], %s11041_s14, %s11041_s14, %s11042_s15  }
  0x39   :  { %s10955_s0 = scalar_lea.vmem %s74_s11, 512  ;;  %p10960_p12 = scmp.lt.s32.totalorder %s74_s11, %s74_s11 }
  0x3a   :  { %p10956_p11 = scmp.ne.s32.totalorder %s74_s11, %s10955_s0  ;;  %p10961_p13 = scmp.lt.s32.totalorder %s10955_s0, %s10955_s0 }
  0x3c   :  { %p10962_p0 = por %p10961_p13, %p10960_p12 }
  0x3e   :  { %p10963_p1 = pnand %p10962_p0, %p10956_p11 }
  0x40   :  { %10966 = shalt.err (!%p10963_p1)
}
  0x41   :  { %79 = dma.hbm_to_vmem [thread:$0]  %s12118_s4, 512, %s74_s11, [#allocation10], %s11041_s14, %s11041_s14, %s11042_s15  }
  0x42   :  { %s11047_s18 = smov [#allocation14]   ;;  %s11048_s20 = smov [#allocation15]  }
  0x43   :  { %s97_s19 = sshll.u32 %s11047_s18, 4  ;;  %s109_s21 = sshll.u32 %s11048_s20, 4  ;;  %s98_s19 = int_to_ptr.vmem [resolvable:$true] %s97_s19  ;;  %s110_s21 = int_to_ptr.vmem [resolvable:$true] %s109_s21 }
  0x44   :  { %s10975_s2 = scalar_lea.vmem %s98_s19, 512  ;;  %p10980_p3 = scmp.lt.s32.totalorder %s98_s19, %s98_s19 }
  0x45   :  { %p10976_p2 = scmp.ne.s32.totalorder %s98_s19, %s10975_s2  ;;  %p10981_p4 = scmp.lt.s32.totalorder %s10975_s2, %s10975_s2 }
  0x47   :  { %p10982_p5 = por %p10981_p4, %p10980_p3 }
  0x49   :  { %p10983_p6 = pnand %p10982_p5, %p10976_p2 }
  0x4b   :  { %10986 = shalt.err (!%p10983_p6)
}
  0x4c   :  { %103 = dma.hbm_to_vmem [thread:$0]  %s12120_s6, 512, %s98_s19, [#allocation13], %s11041_s14, %s11041_s14, %s11042_s15  }
  0x4d   :  { %s10995_s4 = scalar_lea.vmem %s110_s21, 512  ;;  %p11000_p8 = scmp.lt.s32.totalorder %s110_s21, %s110_s21 }
  0x4e   :  { %p10996_p7 = scmp.ne.s32.totalorder %s110_s21, %s10995_s4  ;;  %p11001_p9 = scmp.lt.s32.totalorder %s10995_s4, %s10995_s4 }
  0x50   :  { %p11002_p10 = por %p11001_p9, %p11000_p8 }
  0x52   :  { %p11003_p11 = pnand %p11002_p10, %p10996_p7 }
  0x54   :  { %11006 = shalt.err (!%p11003_p11)
}
  0x55   :  { %115 = dma.hbm_to_vmem [thread:$0]  %s12121_s7, 512, %s110_s21, [#allocation16], %s11041_s14, %s11041_s14, %s11042_s15  }
  0x56   :  { %11027 = dma.done.wait [#allocation4], 256  }
  0x57   :  { %11028 = vsyncadd [#allocation4], 4294967040 }
  0x58   :  { %11029 = dma.done.wait [#allocation7], 512  }
  0x59   :  { %11030 = vsyncadd [#allocation7], 4294966784 }
  0x5a   :  { %11031 = dma.done.wait [#allocation10], 768  }
  0x5b   :  { %11032 = vsyncadd [#allocation10], 4294966528 }
  0x5c   :  { %11033 = dma.done.wait [#allocation13], 1024  }
  0x5d   :  { %11034 = vsyncadd [#allocation13], 4294966272 }
  0x5e   :  { %11035 = dma.done.wait [#allocation16], 512  }
  0x5f   :  { %11036 = vsyncadd [#allocation16], 4294966784  ;;  %vm153_vm0 = vcmask 261120   ;;  %v148_v0 = vld [vmem:[#allocation11 + $0x18] sm:$0xff]  ;;  %v147_v1 = vld [vmem:[#allocation11 + $0x10] sm:$0xff]  ;;  %vm11050_vm1 = vmmov 0  }
  0x60   :  { %v146_v2 = vld [vmem:[#allocation11 + $0x8] sm:$0xff]  ;;  %v11155_v3 = vand.u32 4294901760, %v148_v0  ;;  %v11157_v4 = vand.u32 4294901760, %v147_v1  ;;  %v145_v6 = vld [vmem:[#allocation11] sm:$0xff]  ;;  %v690_v38 = vld [vmem:[#allocation6] sm:$0xff]  ;;  %s11051_s25 = smov 120  }
  0x61   :  { %v11159_v5 = vand.u32 4294901760, %v146_v2  ;;  %v143_v7 = vld [vmem:[#allocation3] sm:$0xff]  ;;  %v144_v8 = vld [vmem:[#allocation3 + $0x8] sm:$0xff]  ;;  %v11161_v9 = vand.u32 4294901760, %v145_v6  ;;  %v695_v39 = vld [vmem:[#allocation12 + $0x18] sm:$0xff]  ;;  %v701_v42 = vsel %vm153_vm0, %v690_v38, 0 }
  0x62   :  { %v155_v10 = vsel %vm153_vm0, %v143_v7, 0  ;;  %v158_v11 = vsel %vm153_vm0, %v144_v8, 0  ;;  %10052 = vmatprep.subr.mxu0 %v11155_v3  ;;  %v275_v12 = vsub.f32 %v148_v0, %v11155_v3  ;;  %v282_v14 = vsub.f32 %v147_v1, %v11157_v4  ;;  %v691_v40 = vld [vmem:[#allocation6 + $0x8] sm:$0xff]  ;;  %v694_v41 = vld [vmem:[#allocation12 + $0x10] sm:$0xff]  ;;  %v693_v46 = vld [vmem:[#allocation12 + $0x8] sm:$0xff]  ;;  %s11052_s26 = smov 112  }
  0x63   :  { %v11167_v13 = vand.u32 4294901760, %v155_v10  ;;  %v11170_v15 = vand.u32 4294901760, %v158_v11  ;;  %10053 = vmatpush3.msra.mxu0 %v11155_v3  ;;  %v289_v16 = vsub.f32 %v146_v2, %v11159_v5  ;;  %v296_v17 = vsub.f32 %v145_v6, %v11161_v9  ;;  %v692_v49 = vld [vmem:[#allocation12] sm:$0xff]  ;;  %s11053_s3 = smov 104   ;;  %s11054_s27 = smov 16  }
  0x64   :  { %10054 = vmatprep.subr.mxu0 %v11157_v4  ;;  %v276_v18 = vand.u32 4294901760, %v275_v12  ;;  %v11179_v20 = vand.u32 4294901760, %v282_v14  ;;  %v11208_v43 = vand.u32 4294901760, %v695_v39  ;;  %v704_v44 = vsel %vm153_vm0, %v691_v40, 0  ;;  %s11055_s28 = smov 24  }
  0x65   :  { %v11177_v19 = vsub.f32 %v155_v10, %v11167_v13  ;;  %v11182_v21 = vsub.f32 %v158_v11, %v11170_v15  ;;  %10071 = vmatprep.mubr.f32.mxu1 %v11167_v13  ;;  %10055 = vmatpush3.msra.mxu0 %v11157_v4  ;;  %v11186_v22 = vand.u32 4294901760, %v289_v16  ;;  %v11188_v23 = vand.u32 4294901760, %v296_v17 }
  0x66   :  { %10056 = vmatprep.subr.mxu0 %v11159_v5  ;;  %v277_v24 = vsub.f32 %v275_v12, %v276_v18  ;;  %v284_v26 = vsub.f32 %v282_v14, %v11179_v20  ;;  %v11214_v45 = vand.u32 4294901760, %v694_v41  ;;  %v11216_v47 = vand.u32 4294901760, %v701_v42 }
  0x67   :  { %v231_v25 = vand.u32 4294901760, %v11177_v19  ;;  %v241_v27 = vand.u32 4294901760, %v11182_v21  ;;  %10057 = vmatpush3.msra.mxu0 %v11159_v5  ;;  %v291_v28 = vsub.f32 %v289_v16, %v11186_v22  ;;  %v298_v29 = vsub.f32 %v296_v17, %v11188_v23 }
  0x68   :  { %10058 = vmatprep.subr.mxu0 %v11161_v9  ;;  %v278_v30 = vand.u32 4294901760, %v277_v24  ;;  %v285_v32 = vand.u32 4294901760, %v284_v26  ;;  %v11219_v48 = vand.u32 4294901760, %v704_v44  ;;  %v11223_v50 = vsub.f32 %v695_v39, %v11208_v43  ;;  %v1235_v24 = vld [vmem:[#allocation8 + $0x8] sm:$0xff] }
  0x69   :  { %v232_v31 = vsub.f32 %v11177_v19, %v231_v25  ;;  %v242_v33 = vsub.f32 %v11182_v21, %v241_v27  ;;  %10059 = vmatpush3.msra.mxu0 %v11161_v9  ;;  %v292_v36 = vand.u32 4294901760, %v291_v28  ;;  %v299_v37 = vand.u32 4294901760, %v298_v29 }
  0x6a   :  { %10063 = vmatprep.subr.mxu1 %v278_v30  ;;  %10074 = vmatprep.subr.mxu0 %v275_v12  ;;  %v11227_v51 = vand.u32 4294901760, %v693_v46  ;;  %v11232_v52 = vsub.f32 %v701_v42, %v11216_v47  ;;  %v828_v53 = vsub.f32 %v694_v41, %v11214_v45  ;;  %v11237_v54 = vand.u32 4294901760, %v692_v49 }
  0x6b   :  { %v233_v34 = vand.u32 4294901760, %v232_v31  ;;  %v243_v35 = vand.u32 4294901760, %v242_v33  ;;  %10064 = vmatpush3.msra.mxu1 %v278_v30  ;;  %v11240_v55 = vsub.f32 %v704_v44, %v11219_v48  ;;  %v11246_v56 = vand.u32 4294901760, %v11223_v50 }
  0x6c   :  { %10065 = vmatprep.subr.mxu1 %v285_v32  ;;  %v835_v57 = vsub.f32 %v693_v46, %v11227_v51  ;;  %v777_v58 = vand.u32 4294901760, %v11232_v52  ;;  %v11255_v59 = vand.u32 4294901760, %v828_v53  ;;  %v842_v61 = vsub.f32 %v692_v49, %v11237_v54 }
  0x6d   :  { %10060 = vmatprep.mubr.f32.mxu0 %v233_v34  ;;  %10066 = vmatpush3.msra.mxu1 %v285_v32  ;;  %v787_v60 = vand.u32 4294901760, %v11240_v55  ;;  %v823_v62 = vsub.f32 %v11223_v50, %v11246_v56  ;;  %v1248_v30 = vsel %vm153_vm0, %v1235_v24, 0  ;;  %vm1781_vm2 = vcmask 64512  }
  0x6e   :  { %10061 = vmatmul.mubr.f32.vlgmr.msra.gmra.mxu0 %v243_v35  ;;  %10067 = vmatprep.subr.mxu1 %v292_v36  ;;  %v836_v63 = vand.u32 4294901760, %v835_v57  ;;  %v778_v0 = vsub.f32 %v11232_v52, %v777_v58  ;;  %v830_v1 = vsub.f32 %v828_v53, %v11255_v59  ;;  %vm3617_vm5 = vcmask 130112  }
  0x6f   :  { %10075 = vmatpush3.msra.mxu0 %v275_v12  ;;  %10068 = vmatpush3.msra.mxu1 %v292_v36  ;;  %v788_v2 = vsub.f32 %v11240_v55, %v787_v60  ;;  %v1239_v12 = vld [vmem:[#allocation14 + $0x18] sm:$0xff]  ;;  %v11350_v36 = vand.u32 4294901760, %v1248_v30  ;;  %vm4540_vm6 = vcmask 195712   ;;  %vm5463_vm7 = vcmask 261312  }
  0x70   :  { %10076 = vmatprep.subr.mxu0 %v282_v14  ;;  %10069 = vmatprep.subr.mxu1 %v299_v37  ;;  %v837_v6 = vsub.f32 %v835_v57, %v836_v63  ;;  %v779_v7 = vand.u32 4294901760, %v778_v0  ;;  %v831_v8 = vand.u32 4294901760, %v830_v1 }
  0x71   :  { %10077 = vmatpush3.msra.mxu0 %v282_v14  ;;  %10070 = vmatpush3.msra.mxu1 %v299_v37  ;;  %v789_v10 = vand.u32 4294901760, %v788_v2  ;;  %v1238_v14 = vld [vmem:[#allocation14 + $0x10] sm:$0xff]  ;;  %v1330_v41 = vsub.f32 %v1248_v30, %v11350_v36 }
  0x72   :  { %10078 = vmatprep.subr.mxu0 %v289_v16  ;;  %10072 = vmatmul.mubr.f32.vlgmr.msra.gmra.mxu1 %v11170_v15  ;;  %v838_v11 = vand.u32 4294901760, %v837_v6 }
  0x73   :  { %10079 = vmatpush3.msra.mxu0 %v289_v16  ;;  %10085 = vmatprep.subr.mxu1 %v11155_v3 }
  0x74   :  { %10080 = vmatprep.subr.mxu0 %v296_v17  ;;  %10082 = vmatprep.mubr.f32.mxu0 %v11177_v19 }
  0x75   :  { %10081 = vmatpush3.msra.mxu0 %v296_v17  ;;  %10086 = vmatpush3.msra.mxu1 %v11155_v3  ;;  %v1237_v17 = vld [vmem:[#allocation14 + $0x8] sm:$0xff] }
  0x76   :  { %10083 = vmatmul.mubr.f32.vlgmr.msra.gmra.mxu0 %v11182_v21  ;;  %10087 = vmatprep.subr.mxu1 %v11157_v4  ;;  %v11332_v19 = vand.u32 4294901760, %v1237_v17  ;;  %v1234_v21 = vld [vmem:[#allocation8] sm:$0xff] }
  0x77   :  { %10096 = vmatprep.subr.mxu0 %v276_v18  ;;  %10088 = vmatpush3.msra.mxu1 %v11157_v4 }
  0x78   :  { %10097 = vmatpush3.msra.mxu0 %v276_v18  ;;  %10089 = vmatprep.subr.mxu1 %v11159_v5  ;;  %v1379_v28 = vsub.f32 %v1237_v17, %v11332_v19 }
  0x79   :  { %10098 = vmatprep.subr.mxu0 %v11179_v20  ;;  %10090 = vmatpush3.msra.mxu1 %v11159_v5 }
  0x7a   :  { %10099 = vmatpush3.msra.mxu0 %v11179_v20  ;;  %10091 = vmatprep.subr.mxu1 %v11161_v9  ;;  %v1380_v33 = vand.u32 4294901760, %v1379_v28 }
  0x7b   :  { %10100 = vmatprep.subr.mxu0 %v11186_v22  ;;  %10092 = vmatpush3.msra.mxu1 %v11161_v9 }
  0x7c   :  { %10093 = vmatprep.mubr.f32.mxu1 %v231_v25  ;;  %10101 = vmatpush3.msra.mxu0 %v11186_v22  ;;  %v1236_v22 = vld [vmem:[#allocation14] sm:$0xff]  ;;  %v1381_v38 = vsub.f32 %v1379_v28, %v1380_v33 }
  0x7d   :  { %10094 = vmatmul.mubr.f32.vlgmr.msra.gmra.mxu1 %v241_v27  ;;  %10102 = vmatprep.subr.mxu0 %v11188_v23  ;;  %v11339_v27 = vand.u32 4294901760, %v1236_v22 }
  0x7e   :  { %10107 = vmatprep.subr.mxu1 %v11155_v3  ;;  %10103 = vmatpush3.msra.mxu0 %v11188_v23  ;;  %v1245_v23 = vsel %vm153_vm0, %v1234_v21, 0  ;;  %v1382_v42 = vand.u32 4294901760, %v1381_v38 }
  0x7f   :  { %10104 = vmatprep.mubr.f32.mxu0 %v11167_v13  ;;  %10108 = vmatpush3.msra.mxu1 %v11155_v3  ;;  %v843_v3 = vand.u32 4294901760, %v842_v61  ;;  %v11343_v29 = vand.u32 4294901760, %v1245_v23  ;;  %v1386_v34 = vsub.f32 %v1236_v22, %v11339_v27 }
  0x80   :  { %10105 = vmatmul.mubr.f32.vlgmr.msra.gmra.mxu0 %v11170_v15  ;;  %10109 = vmatprep.subr.mxu1 %v11157_v4 }
  0x81   :  { %10118 = vmatprep.subr.mxu0 %v11208_v43  ;;  %10110 = vmatpush3.msra.mxu1 %v11157_v4  ;;  %v824_v4 = vand.u32 4294901760, %v823_v62  ;;  %v1320_v35 = vsub.f32 %v1245_v23, %v11343_v29  ;;  %v1387_v39 = vand.u32 4294901760, %v1386_v34 }
  0x82   :  { %10119 = vmatpush3.msra.mxu0 %v11208_v43  ;;  %10111 = vmatprep.subr.mxu1 %v11159_v5 }
  0x83   :  { %10120 = vmatprep.subr.mxu0 %v11214_v45  ;;  %10112 = vmatpush3.msra.mxu1 %v11159_v5  ;;  %v844_v5 = vsub.f32 %v842_v61, %v843_v3  ;;  %v1321_v40 = vand.u32 4294901760, %v1320_v35 }
  0x84   :  { %10121 = vmatpush3.msra.mxu0 %v11214_v45  ;;  %10113 = vmatprep.subr.mxu1 %v11161_v9 }
  0x85   :  { %10122 = vmatprep.subr.mxu0 %v11227_v51  ;;  %10114 = vmatpush3.msra.mxu1 %v11161_v9  ;;  %v845_v9 = vand.u32 4294901760, %v844_v5  ;;  %v1322_v44 = vsub.f32 %v1320_v35, %v1321_v40 }
  0x86   :  { %10115 = vmatprep.mubr.f32.mxu1 %v11167_v13  ;;  %10123 = vmatpush3.msra.mxu0 %v11227_v51  ;;  %v11322_v13 = vand.u32 4294901760, %v1239_v12 }
  0x87   :  { %10116 = vmatmul.mubr.f32.vlgmr.msra.gmra.mxu1 %v11170_v15  ;;  %10124 = vmatprep.subr.mxu0 %v11237_v54  ;;  %v11325_v15 = vand.u32 4294901760, %v1238_v14 }
  0x88   :  { %10129 = vmatprep.subr.mxu1 %v824_v4  ;;  %10125 = vmatpush3.msra.mxu0 %v11237_v54  ;;  %v1365_v16 = vsub.f32 %v1239_v12, %v11322_v13 }
  0x89   :  { %10130 = vmatpush3.msra.mxu1 %v824_v4  ;;  %10126 = vmatprep.mubr.f32.mxu0 %v779_v7  ;;  %v1372_v20 = vsub.f32 %v1238_v14, %v11325_v15 }
  0x8a   :  { %10131 = vmatprep.subr.mxu1 %v831_v8  ;;  %10140 = vmatprep.subr.mxu0 %v11223_v50  ;;  %v11330_v18 = vand.u32 4294901760, %v1365_v16 }
  0x8b   :  { %10127 = vmatmul.mubr.f32.vlgmr.msra.gmra.mxu0 %v789_v10  ;;  %10132 = vmatpush3.msra.mxu1 %v831_v8  ;;  %v1373_v26 = vand.u32 4294901760, %v1372_v20 }
  0x8c   :  { %10141 = vmatpush3.msra.mxu0 %v11223_v50  ;;  %10133 = vmatprep.subr.mxu1 %v838_v11  ;;  %v1367_v25 = vsub.f32 %v1365_v16, %v11330_v18  ;;  %v11049_v50 = vmov 0.0  }
  0x8d   :  { %10142 = vmatprep.subr.mxu0 %v828_v53  ;;  %10134 = vmatpush3.msra.mxu1 %v838_v11  ;;  %v1374_v32 = vsub.f32 %v1372_v20, %v1373_v26 }
  0x8e   :  { %10143 = vmatpush3.msra.mxu0 %v828_v53  ;;  %10135 = vmatprep.subr.mxu1 %v845_v9  ;;  %v1368_v31 = vand.u32 4294901760, %v1367_v25 }
  0x8f   :  { %10144 = vmatprep.subr.mxu0 %v835_v57  ;;  %10136 = vmatpush3.msra.mxu1 %v845_v9  ;;  %v1375_v37 = vand.u32 4294901760, %v1374_v32 }
  0x90   :  { %10137 = vmatprep.mubr.f32.mxu1 %v11216_v47  ;;  %10145 = vmatpush3.msra.mxu0 %v835_v57 }
  0x91   :  { %10138 = vmatmul.mubr.f32.vlgmr.msra.gmra.mxu1 %v11219_v48  ;;  %10146 = vmatprep.subr.mxu0 %v842_v61 }
  0x92   :  { %10151 = vmatprep.subr.mxu1 %v11208_v43  ;;  %10147 = vmatpush3.msra.mxu0 %v842_v61 }
  0x93   :  { %10148 = vmatprep.mubr.f32.mxu0 %v11232_v52  ;;  %10152 = vmatpush3.msra.mxu1 %v11208_v43 }
  0x94   :  { %10149 = vmatmul.mubr.f32.vlgmr.msra.gmra.mxu0 %v11240_v55  ;;  %10153 = vmatprep.subr.mxu1 %v11214_v45 }
  0x95   :  { %10162 = vmatprep.subr.mxu0 %v11246_v56  ;;  %10154 = vmatpush3.msra.mxu1 %v11214_v45 }
  0x96   :  { %10163 = vmatpush3.msra.mxu0 %v11246_v56  ;;  %10155 = vmatprep.subr.mxu1 %v11227_v51 }
  0x97   :  { %10164 = vmatprep.subr.mxu0 %v11255_v59  ;;  %10156 = vmatpush3.msra.mxu1 %v11227_v51 }
  0x98   :  { %10165 = vmatpush3.msra.mxu0 %v11255_v59  ;;  %10157 = vmatprep.subr.mxu1 %v11237_v54 }
  0x99   :  { %10166 = vmatprep.subr.mxu0 %v836_v63  ;;  %10158 = vmatpush3.msra.mxu1 %v11237_v54 }
  0x9a   :  { %10159 = vmatprep.mubr.f32.mxu1 %v777_v58  ;;  %10167 = vmatpush3.msra.mxu0 %v836_v63 }
  0x9b   :  { %10160 = vmatmul.mubr.f32.vlgmr.msra.gmra.mxu1 %v787_v60  ;;  %10168 = vmatprep.subr.mxu0 %v843_v3 }
  0x9c   :  { %10173 = vmatprep.subr.mxu1 %v11208_v43  ;;  %10169 = vmatpush3.msra.mxu0 %v843_v3 }
  0x9d   :  { %10170 = vmatprep.mubr.f32.mxu0 %v11216_v47  ;;  %10174 = vmatpush3.msra.mxu1 %v11208_v43  ;;  %v1388_v43 = vsub.f32 %v1386_v34, %v1387_v39 }
  0x9e   :  { %10171 = vmatmul.mubr.f32.vlgmr.msra.gmra.mxu0 %v11219_v48  ;;  %10175 = vmatprep.subr.mxu1 %v11214_v45 }
  0x9f   :  { %10181 = vmatprep.mubr.f32.mxu1 %v11216_v47  ;;  %10176 = vmatpush3.msra.mxu1 %v11214_v45  ;;  %v1331_v45 = vand.u32 4294901760, %v1330_v41  ;;  %v1389_v46 = vand.u32 4294901760, %v1388_v43  ;;  %v1323_v47 = vand.u32 4294901760, %v1322_v44 }
  0xa0   :  { %10177 = vmatprep.subr.mxu1 %v11227_v51  ;;  %10184 = vmatprep.subr.mxu0 %v11322_v13 }
  0xa1   :  { %10178 = vmatpush3.msra.mxu1 %v11227_v51  ;;  %10185 = vmatpush3.msra.mxu0 %v11322_v13  ;;  %v149_v51 = vlaneseq }
  0xa2   :  { %10179 = vmatprep.subr.mxu1 %v11237_v54  ;;  %10186 = vmatprep.subr.mxu0 %v11325_v15 }
  0xa3   :  { %10180 = vmatpush3.msra.mxu1 %v11237_v54  ;;  %10187 = vmatpush3.msra.mxu0 %v11325_v15  ;;  %v11383_v52 = vshrl.u32 %v149_v51, 7  ;;  %v11389_v54 = vld [vmem:[%s12122_s8] sm:$0xf] }
  0xa4   :  { %10182 = vmatmul.mubr.f32.vlgmr.msra.gmra.mxu1 %v11219_v48  ;;  %10188 = vmatprep.subr.mxu0 %v11332_v19  ;;  %v1332_v48 = vsub.f32 %v1330_v41, %v1331_v45 }
  0xa5   :  { %10189 = vmatpush3.msra.mxu0 %v11332_v19  ;;  %10203 = vmatprep.mubr.f32.mxu1 %v11343_v29  ;;  %v151_v53 = vsub.s32 0, %v11383_v52  ;;  %v698_v11 = vsub.s32 1, %v11383_v52 }
  0xa6   :  { %10190 = vmatprep.subr.mxu0 %v11339_v27  ;;  %10195 = vmatprep.subr.mxu1 %v1368_v31  ;;  %v1333_v49 = vand.u32 4294901760, %v1332_v48 }
  0xa7   :  { %10191 = vmatpush3.msra.mxu0 %v11339_v27  ;;  %10196 = vmatpush3.msra.mxu1 %v1368_v31  ;;  %v152_v55 = vrot.slane %v11389_v54, %v151_v53 }
  0xa8   :  { %10206 = vmatprep.subr.mxu0 %v1365_v16  ;;  %10197 = vmatprep.subr.mxu1 %v1375_v37 }
  0xa9   :  { %10198 = vmatpush3.msra.mxu1 %v1375_v37  ;;  %10192 = vmatprep.mubr.f32.mxu0 %v1323_v47 }
  0xaa   :  { %10199 = vmatprep.subr.mxu1 %v1382_v42  ;;  %10193 = vmatmul.mubr.f32.vlgmr.msra.gmra.mxu0 %v1333_v49 }
  0xab   :  { %10200 = vmatpush3.msra.mxu1 %v1382_v42  ;;  %10207 = vmatpush3.msra.mxu0 %v1365_v16 }
  0xac   :  { %10201 = vmatprep.subr.mxu1 %v1389_v46  ;;  %10208 = vmatprep.subr.mxu0 %v1372_v20 }
  0xad   :  { %10202 = vmatpush3.msra.mxu1 %v1389_v46  ;;  %10209 = vmatpush3.msra.mxu0 %v1372_v20 }
  0xae   :  { %10217 = vmatprep.subr.mxu1 %v11322_v13  ;;  %10204 = vmatmul.mubr.f32.vlgmr.msra.gmra.mxu1 %v11350_v36 }
  0xaf   :  { %10218 = vmatpush3.msra.mxu1 %v11322_v13  ;;  %10210 = vmatprep.subr.mxu0 %v1379_v28 }
  0xb0   :  { %10219 = vmatprep.subr.mxu1 %v11325_v15  ;;  %10211 = vmatpush3.msra.mxu0 %v1379_v28 }
  0xb1   :  { %10220 = vmatpush3.msra.mxu1 %v11325_v15  ;;  %10214 = vmatprep.mubr.f32.mxu0 %v1320_v35 }
  0xb2   :  { %10221 = vmatprep.subr.mxu1 %v11332_v19  ;;  %10212 = vmatprep.subr.mxu0 %v1386_v34 }
  0xb3   :  { %10222 = vmatpush3.msra.mxu1 %v11332_v19  ;;  %10213 = vmatpush3.msra.mxu0 %v1386_v34 }
  0xb4   :  { %10223 = vmatprep.subr.mxu1 %v11339_v27  ;;  %10228 = vmatprep.subr.mxu0 %v11330_v18 }
  0xb5   :  { %10224 = vmatpush3.msra.mxu1 %v11339_v27  ;;  %10215 = vmatmul.mubr.f32.vlgmr.msra.gmra.mxu0 %v1330_v41 }
  0xb6   :  { %10229 = vmatpush3.msra.mxu0 %v11330_v18  ;;  %10225 = vmatprep.mubr.f32.mxu1 %v1321_v40 }
  0xb7   :  { %10230 = vmatprep.subr.mxu0 %v1373_v26  ;;  %10239 = vmatprep.subr.mxu1 %v11322_v13 }
  0xb8   :  { %10226 = vmatmul.mubr.f32.vlgmr.msra.gmra.mxu1 %v1331_v45  ;;  %10231 = vmatpush3.msra.mxu0 %v1373_v26 }
  0xb9   :  { %10240 = vmatpush3.msra.mxu1 %v11322_v13  ;;  %10232 = vmatprep.subr.mxu0 %v1380_v33 }
  0xba   :  { %10241 = vmatprep.subr.mxu1 %v11325_v15  ;;  %10233 = vmatpush3.msra.mxu0 %v1380_v33 }
  0xbb   :  { %10242 = vmatpush3.msra.mxu1 %v11325_v15  ;;  %10234 = vmatprep.subr.mxu0 %v1387_v39  ;;  %v699_v15 = vrot.slane %v11389_v54, %v698_v11 }
  0xbc   :  { %10243 = vmatprep.subr.mxu1 %v11332_v19  ;;  %10235 = vmatpush3.msra.mxu0 %v1387_v39 }
  0xbd   :  { %10236 = vmatprep.mubr.f32.mxu0 %v11343_v29  ;;  %10244 = vmatpush3.msra.mxu1 %v11332_v19 }
  0xbe   :  { %10237 = vmatmul.mubr.f32.vlgmr.msra.gmra.mxu0 %v11350_v36  ;;  %10245 = vmatprep.subr.mxu1 %v11339_v27 }
  0xbf   :  { %10246 = vmatpush3.msra.mxu1 %v11339_v27  ;;  %10247 = vmatprep.mubr.f32.mxu1 %v11343_v29 }
  0xc0   :  { %10248 = vmatmul.mubr.f32.vlgmr.msra.gmra.mxu1 %v11350_v36  ;;  %10250 = vmatprep.subr.mxu0 %v11049_v50 }
  0xc1   :  { %10255 = vmatprep.subr.mxu1 %v11049_v50  ;;  %10252 = vmatprep.mubr.msk.f32.mxu0 %vm11050_vm1, %v11049_v50 }
  0xc2   :  { %10257 = vmatprep.mubr.msk.f32.mxu1 %vm11050_vm1, %v11049_v50 }
 0x12e   :  { %v10062_v56 = vpop.f32.mrf.mxu0 }
 0x12f   :  { %v246_v57 = vadd.f32 %v10062_v56, %v152_v55 }
 0x130   :  { %v235_v58 = vpop.f32.mrf.mxu0 }
 0x131   :  { %v236_v63 = vadd.f32 %v235_v58, %v152_v55  ;;  %v1242_v58 = vsub.s32 2, %v11383_v52 }
 0x132   :  { %v10073_v59 = vpop.f32.mrf.mxu1 }
 0x133   :  { %v343_v60 = vadd.f32 %v10073_v59, %v246_v57  ;;  %v1243_v59 = vrot.slane %v11389_v54, %v1242_v58 }
 0x134   :  { %v336_v0 = vpop.f32.mrf.mxu1 }
 0x135   :  { %v337_v2 = vadd.f32 %v336_v0, %v236_v63 }
 0x136   :  { %v10084_v61 = vpop.f32.mrf.mxu0 }
 0x137   :  { %v430_v62 = vadd.f32 %v10084_v61, %v343_v60 }
 0x138   :  { %v422_v3 = vpop.f32.mrf.mxu0 }
 0x139   :  { %v423_v10 = vadd.f32 %v422_v3, %v337_v2 }
 0x13d   :  { %v10095_v1 = vpop.f32.mrf.mxu1 }
 0x13e   :  { %v515_v4 = vadd.f32 %v10095_v1, %v430_v62 }
 0x13f   :  { %v506_v7 = vpop.f32.mrf.mxu1 }
 0x140   :  { %v10106_v6 = vpop.f32.mrf.mxu0  ;;  %v507_v5 = vadd.f32 %v506_v7, %v423_v10 }
 0x141   :  { %v604_v8 = vadd.f32 %v10106_v6, %v515_v4 }
 0x142   :  { %v597_v9 = vpop.f32.mrf.mxu0 }
 0x143   :  { %v598_v13 = vadd.f32 %v597_v9, %v507_v5 }
 0x147   :  { %v10117_v12 = vpop.f32.mrf.mxu1 }
 0x148   :  { %v11393_v14 = vadd.f32 %v10117_v12, %v604_v8 }
 0x149   :  { %v678_v16 = vpop.f32.mrf.mxu1 }
 0x14a   :  { %v679_v17 = vadd.f32 %v678_v16, %v598_v13 }
 0x14b   :  { %v10128_v18 = vpop.f32.mrf.mxu0 }
 0x14c   :  { %v11396_v19 = vmul.f32 0.35355338, %v679_v17  ;;  %v792_v20 = vadd.f32 %v10128_v18, %v699_v15 }
 0x14d   :  { %v781_v21 = vpop.f32.mrf.mxu0 }
 0x14e   :  { %2695 = vrot.lane.b32.xlu1 %v11396_v19, %s11051_s25  ;;  %v782_v26 = vadd.f32 %v781_v21, %v699_v15  ;;  %v1783_v28 = vsel %vm1781_vm2, %v11396_v19, 0 }
 0x14f   :  { %v1854_v33 = vand.u32 4294901760, %v1783_v28 }
 0x151   :  { %v10139_v22 = vpop.f32.mrf.mxu1  ;;  %v1855_v38 = vsub.f32 %v1783_v28, %v1854_v33 }
 0x152   :  { %v889_v23 = vadd.f32 %v10139_v22, %v792_v20 }
 0x153   :  { %v882_v27 = vpop.f32.mrf.mxu1  ;;  %v1856_v44 = vand.u32 4294901760, %v1855_v38 }
 0x154   :  { %v10150_v24 = vpop.f32.mrf.mxu0  ;;  %v883_v30 = vadd.f32 %v882_v27, %v782_v26  ;;  %v1778_v26 = vld [vmem:[#allocation9] sm:$0xff] }
 0x155   :  { %v976_v25 = vadd.f32 %v10150_v24, %v889_v23  ;;  %v1857_v48 = vsub.f32 %v1855_v38, %v1856_v44  ;;  %vm1779_vm3 = vcmp.eq.f32.partialorder %v1778_v26, 0.0 }
 0x156   :  { %v968_v31 = vpop.f32.mrf.mxu0 }
 0x157   :  { %v969_v37 = vadd.f32 %v968_v31, %v883_v30  ;;  %v1858_v53 = vand.u32 4294901760, %v1857_v48 }
 0x15b   :  { %v10161_v29 = vpop.f32.mrf.mxu1 }
 0x15c   :  { %v1061_v32 = vadd.f32 %v10161_v29, %v976_v25  ;;  %v11447_v29 = vsel %vm1779_vm3, -1e+09, %v11049_v50 }
 0x15d   :  { %v1052_v35 = vpop.f32.mrf.mxu1 }
 0x15e   :  { %v10172_v34 = vpop.f32.mrf.mxu0  ;;  %v1053_v39 = vadd.f32 %v1052_v35, %v969_v37 }
 0x15f   :  { %v1150_v36 = vadd.f32 %v10172_v34, %v1061_v32 }
 0x160   :  { %v1143_v40 = vpop.f32.mrf.mxu0 }
 0x161   :  { %v1144_v42 = vadd.f32 %v1143_v40, %v1053_v39 }
 0x164   :  { %v10183_v41 = vpop.f32.mrf.mxu1 }
 0x165   :  { %v11402_v43 = vadd.f32 %v10183_v41, %v1150_v36 }
 0x166   :  { %v1224_v45 = vpop.f32.mrf.mxu1 }
 0x167   :  { %v11404_v46 = vadd.f32 %v1224_v45, %v1144_v42 }
 0x169   :  { %v1786_v47 = vsel %vm1781_vm2, %v11404_v46, 0 }
 0x16a   :  { %v1819_v49 = vand.u32 4294901760, %v1786_v47  ;;  %v10194_v60 = vpop.f32.mrf.mxu0 }
 0x16b   :  { %v1336_v61 = vadd.f32 %v10194_v60, %v1243_v59 }
 0x16c   :  { %10251 = vmatpush3.xpose.msra.mxu0 %v1819_v49  ;;  %v1896_v51 = vsub.f32 %v1786_v47, %v1819_v49  ;;  %v1325_v63 = vpop.f32.mrf.mxu0 }
 0x16d   :  { %10260 = vmatprep.subr.mxu0 %v11049_v50  ;;  %v1326_v1 = vadd.f32 %v1325_v63, %v1243_v59 }
 0x16e   :  { %v1897_v55 = vand.u32 4294901760, %v1896_v51  ;;  %v10205_v62 = vpop.f32.mrf.mxu1 }
 0x16f   :  { %10253 = vmatmul.mubr.f32.vlgmr.msra.gmra.mxu0 %v1858_v53  ;;  %v1433_v0 = vadd.f32 %v10205_v62, %v1336_v61 }
 0x170   :  { %10261 = vmatpush3.xpose.msra.mxu0 %v1896_v51  ;;  %10262 = vmatprep.mubr.msk.f32.mxu0 %vm11050_vm1, %v11049_v50  ;;  %v1898_v56 = vsub.f32 %v1896_v51, %v1897_v55  ;;  %v1426_v2 = vpop.f32.mrf.mxu1 }
 0x171   :  { %10270 = vmatprep.subr.mxu0 %v11049_v50  ;;  %v1427_v3 = vadd.f32 %v1426_v2, %v1326_v1 }
 0x172   :  { %v1899_v57 = vand.u32 4294901760, %v1898_v56 }
 0x173   :  { %10263 = vmatmul.mubr.f32.vlgmr.msra.gmra.mxu0 %v1855_v38 }
 0x174   :  { %10256 = vmatpush3.xpose.msra.mxu1 %v1899_v57  ;;  %10271 = vmatpush3.xpose.msra.mxu0 %v1897_v55 }
 0x175   :  { %10272 = vmatprep.mubr.msk.f32.mxu0 %vm11050_vm1, %v11049_v50  ;;  %10265 = vmatprep.subr.mxu1 %v11049_v50  ;;  %v10216_v4 = vpop.f32.mrf.mxu0 }
 0x176   :  { %10280 = vmatprep.subr.mxu0 %v11049_v50  ;;  %v1520_v6 = vadd.f32 %v10216_v4, %v1433_v0 }
 0x177   :  { %10258 = vmatmul.mubr.f32.vlgmr.msra.gmra.mxu1 %v1854_v33  ;;  %10273 = vmatmul.mubr.f32.vlgmr.msra.gmra.mxu0 %v1854_v33  ;;  %v1512_v7 = vpop.f32.mrf.mxu0 }
 0x178   :  { %10266 = vmatpush3.xpose.msra.mxu1 %v1819_v49  ;;  %10267 = vmatprep.mubr.msk.f32.mxu1 %vm11050_vm1, %v11049_v50  ;;  %v10227_v8 = vpop.f32.mrf.mxu1  ;;  %v1513_v10 = vadd.f32 %v1512_v7, %v1427_v3 }
 0x179   :  { %10275 = vmatprep.subr.mxu1 %v11049_v50  ;;  %10282 = vmatprep.mubr.msk.f32.mxu0 %vm11050_vm1, %v11049_v50  ;;  %v1605_v5 = vadd.f32 %v10227_v8, %v1520_v6 }
 0x17a   :  { %v1596_v11 = vpop.f32.mrf.mxu1 }
 0x17b   :  { %10268 = vmatmul.mubr.f32.vlgmr.msra.gmra.mxu1 %v1856_v44  ;;  %v1597_v9 = vadd.f32 %v1596_v11, %v1513_v10 }
 0x17c   :  { %10276 = vmatpush3.xpose.msra.mxu1 %v1819_v49  ;;  %10277 = vmatprep.mubr.msk.f32.mxu1 %vm11050_vm1, %v11049_v50 }
 0x17d   :  { %10285 = vmatprep.subr.mxu1 %v11049_v50 }
 0x17e   :  { %v10238_v12 = vpop.f32.mrf.mxu0 }
 0x17f   :  { %10278 = vmatmul.mubr.f32.vlgmr.msra.gmra.mxu1 %v1854_v33  ;;  %v1694_v13 = vadd.f32 %v10238_v12, %v1605_v5 }
 0x180   :  { %10287 = vmatprep.mubr.msk.f32.mxu1 %vm11050_vm1, %v11049_v50  ;;  %v1687_v15 = vpop.f32.mrf.mxu0  ;;  %v10249_v54 = vpop.f32.mrf.mxu1 }
 0x181   :  { %v1688_v16 = vadd.f32 %v1687_v15, %v1597_v9  ;;  %v11428_v17 = vadd.f32 %v10249_v54, %v1694_v13 }
 0x182   :  { %v1768_v18 = vpop.f32.mrf.mxu1 }
 0x183   :  { %v11430_v20 = vadd.f32 %v1768_v18, %v1688_v16 }
 0x185   :  { %v11433_v21 = vand.u32 4294901760, %v11430_v20 }
 0x187   :  { %10281 = vmatpush3.msra.mxu0 %v11433_v21  ;;  %v11438_v22 = vsub.f32 %v11430_v20, %v11433_v21 }
 0x188   :  { %10290 = vmatprep.subr.mxu0 %v11049_v50 }
 0x189   :  { %v2355_v23 = vand.u32 4294901760, %v11438_v22 }
 0x18b   :  { %v2356_v24 = vsub.f32 %v11438_v22, %v2355_v23 }
 0x18d   :  { %v2357_v25 = vand.u32 4294901760, %v2356_v24 }
 0x18f   :  { %10286 = vmatpush3.msra.mxu1 %v2357_v25 }
 0x190   :  { %10295 = vmatprep.subr.mxu1 %v11049_v50 }
 0x1c0   :  { %v2696_v60 = vpop.permute.xlu1 %2695 }
 0x1c1   :  { %v2699_v63 = vsel %vm1781_vm2, %v2696_v60, 0 }
 0x1c2   :  { %v2769_v3 = vand.u32 4294901760, %v2699_v63 }
 0x1c4   :  { %v2770_v10 = vsub.f32 %v2699_v63, %v2769_v3 }
 0x1c6   :  { %v2771_v12 = vand.u32 4294901760, %v2770_v10 }
 0x1c8   :  { %v2772_v15 = vsub.f32 %v2770_v10, %v2771_v12 }
 0x1ca   :  { %v2773_v16 = vand.u32 4294901760, %v2772_v15 }
 0x22f   :  { %v1860_v27 = vpop.f32.mrf.mxu0 }
 0x230   :  { %v1861_v32 = vadd.f32 %v1860_v27, %v11447_v29 }
 0x231   :  { %v10254_v28 = vpop.f32.mrf.mxu0 }
 0x233   :  { %v2010_v30 = vpop.f32.mrf.mxu0 }
 0x235   :  { %v10264_v31 = vpop.f32.mrf.mxu0 }
 0x237   :  { %v1936_v33 = vpop.f32.mrf.mxu1  ;;  %v2158_v34 = vpop.f32.mrf.mxu0 }
 0x238   :  { %v1937_v35 = vadd.f32 %v1936_v33, %v1861_v32 }
 0x239   :  { %v10259_v36 = vpop.f32.mrf.mxu1  ;;  %v10274_v37 = vpop.f32.mrf.mxu0 }
 0x23a   :  { %v2011_v38 = vadd.f32 %v2010_v30, %v1937_v35 }
 0x23b   :  { %v2084_v39 = vpop.f32.mrf.mxu1 }
 0x23c   :  { %v2085_v40 = vadd.f32 %v2084_v39, %v2011_v38 }
 0x23d   :  { %v10269_v41 = vpop.f32.mrf.mxu1 }
 0x23e   :  { %v2159_v42 = vadd.f32 %v2158_v34, %v2085_v40 }
 0x23f   :  { %v2230_v44 = vpop.f32.mrf.mxu1 }
 0x240   :  { %v2231_v45 = vadd.f32 %v2230_v44, %v2159_v42 }
 0x241   :  { %v10279_v47 = vpop.f32.mrf.mxu1 }
 0x242   :  { %v2234_v48 = vsel %vm1781_vm2, %v2231_v45, -inf }
 0x243   :  { %2235 = vmax.xlane.f32.xlu0 %v2234_v48 }
 0x259   :  { %2697 = vrot.lane.b32.xlu0 %v11404_v46, %s11051_s25 }
 0x25d   :  { %3159 = vrot.lane.b32.xlu0 %v11430_v20, %s11051_s25 }
 0x261   :  { %3621 = vrot.lane.b32.xlu0 %v11404_v46, %s11052_s26 }
 0x265   :  { %3619 = vrot.lane.b32.xlu0 %v11396_v19, %s11052_s26 }
 0x2cc   :  { %v2236_v49 = vpop.xlane.xlu0 %2235 }
 0x2cd   :  { %v2237_v51 = vsub.f32 %v2231_v45, %v2236_v49 }
 0x2cf   :  { %v2238_v53 = vmul.f32 1.442695, %v2237_v51 }
 0x2d0   :  { %v2698_v55 = vpop.permute.xlu0 %2697 }
 0x2d1   :  { %10814 = vpow2.f32 %v2238_v53  ;;  %v2701_v56 = vsel %vm1781_vm2, %v2698_v55, 0 }
 0x2d2   :  { %v2734_v57 = vand.u32 4294901760, %v2701_v56 }
 0x2d4   :  { %v11460_v58 = vsub.f32 %v2701_v56, %v2734_v57  ;;  %v3160_v1 = vpop.permute.xlu0 %3159 }
 0x2d5   :  { %v11473_v7 = vand.u32 4294901760, %v3160_v1 }
 0x2d6   :  { %v2812_v0 = vand.u32 4294901760, %v11460_v58 }
 0x2d7   :  { %v11480_v9 = vsub.f32 %v3160_v1, %v11473_v7 }
 0x2d8   :  { %v2813_v6 = vsub.f32 %v11460_v58, %v2812_v0 }
 0x2d9   :  { %v3274_v13 = vand.u32 4294901760, %v11480_v9 }
 0x2da   :  { %v2814_v11 = vand.u32 4294901760, %v2813_v6 }
 0x2db   :  { %v3275_v54 = vsub.f32 %v11480_v9, %v3274_v13 }
 0x2dd   :  { %v3276_v18 = vand.u32 4294901760, %v3275_v54 }
 0x2de   :  { %v11462_v59 = vpop.eup %10814 }
 0x2df   :  { %v2244_v61 = vsel %vm1781_vm2, %v11462_v59, 0 }
 0x2e0   :  { %v2312_v62 = vand.u32 4294901760, %v2244_v61 }
 0x2e2   :  { %v2313_v2 = vsub.f32 %v2244_v61, %v2312_v62  ;;  %10288 = vmatmul.mubr.f32.vlgmr.msra.gmra.mxu1 %v2312_v62 }
 0x2e3   :  { %10296 = vmatpush3.msra.mxu1 %v11433_v21  ;;  %10297 = vmatprep.mubr.msk.f32.mxu1 %vm11050_vm1, %v11049_v50 }
 0x2e4   :  { %10305 = vmatprep.subr.mxu1 %v11049_v50  ;;  %v2314_v4 = vand.u32 4294901760, %v2313_v2 }
 0x2e6   :  { %10298 = vmatmul.mubr.f32.vlgmr.msra.gmra.mxu1 %v2314_v4  ;;  %v2315_v8 = vsub.f32 %v2313_v2, %v2314_v4 }
 0x2e7   :  { %10306 = vmatpush3.msra.mxu1 %v11433_v21  ;;  %10307 = vmatprep.mubr.msk.f32.mxu1 %vm11050_vm1, %v11049_v50 }
 0x2e8   :  { %10315 = vmatprep.subr.mxu1 %v11049_v50  ;;  %v2316_v5 = vand.u32 4294901760, %v2315_v8 }
 0x2ea   :  { %10283 = vmatmul.mubr.f32.vlgmr.msra.gmra.mxu0 %v2316_v5  ;;  %10308 = vmatmul.mubr.f32.vlgmr.msra.gmra.mxu1 %v2312_v62 }
 0x2eb   :  { %10291 = vmatpush3.msra.mxu0 %v11438_v22  ;;  %10316 = vmatpush3.xpose.msra.mxu1 %v2814_v11 }
 0x2ec   :  { %10292 = vmatprep.mubr.msk.f32.mxu0 %vm11050_vm1, %v11049_v50  ;;  %10300 = vmatprep.subr.mxu0 %v11049_v50 }
 0x2ed   :  { %10317 = vmatprep.mubr.msk.f32.mxu1 %vm11050_vm1, %v11049_v50  ;;  %10325 = vmatprep.subr.mxu1 %v11049_v50 }
 0x2ee   :  { %10293 = vmatmul.mubr.f32.vlgmr.msra.gmra.mxu0 %v2313_v2  ;;  %10318 = vmatmul.mubr.f32.vlgmr.msra.gmra.mxu1 %v2769_v3 }
 0x2ef   :  { %10301 = vmatpush3.msra.mxu0 %v2355_v23  ;;  %10326 = vmatpush3.xpose.msra.mxu1 %v2734_v57 }
 0x2f0   :  { %10302 = vmatprep.mubr.msk.f32.mxu0 %vm11050_vm1, %v11049_v50  ;;  %10310 = vmatprep.subr.mxu0 %v11049_v50 }
 0x2f1   :  { %10327 = vmatprep.mubr.msk.f32.mxu1 %vm11050_vm1, %v11049_v50  ;;  %10335 = vmatprep.subr.mxu1 %v11049_v50 }
 0x2f2   :  { %10303 = vmatmul.mubr.f32.vlgmr.msra.gmra.mxu0 %v2312_v62  ;;  %10328 = vmatmul.mubr.f32.vlgmr.msra.gmra.mxu1 %v2771_v12 }
 0x2f3   :  { %10311 = vmatpush3.xpose.msra.mxu0 %v2734_v57  ;;  %10336 = vmatpush3.xpose.msra.mxu1 %v2734_v57 }
 0x2f4   :  { %10312 = vmatprep.mubr.msk.f32.mxu0 %vm11050_vm1, %v11049_v50  ;;  %10320 = vmatprep.subr.mxu0 %v11049_v50 }
 0x2f5   :  { %10337 = vmatprep.mubr.msk.f32.mxu1 %vm11050_vm1, %v11049_v50  ;;  %10345 = vmatprep.subr.mxu1 %v11049_v50 }
 0x2f6   :  { %10313 = vmatmul.mubr.f32.vlgmr.msra.gmra.mxu0 %v2773_v16  ;;  %10338 = vmatmul.mubr.f32.vlgmr.msra.gmra.mxu1 %v2769_v3 }
 0x2f7   :  { %10321 = vmatpush3.xpose.msra.mxu0 %v11460_v58  ;;  %10346 = vmatpush3.msra.mxu1 %v3276_v18 }
 0x2f8   :  { %10322 = vmatprep.mubr.msk.f32.mxu0 %vm11050_vm1, %v11049_v50  ;;  %10330 = vmatprep.subr.mxu0 %v11049_v50 }
 0x2f9   :  { %10347 = vmatprep.mubr.msk.f32.mxu1 %vm11050_vm1, %v11049_v50  ;;  %10355 = vmatprep.subr.mxu1 %v11049_v50 }
 0x2fa   :  { %10323 = vmatmul.mubr.f32.vlgmr.msra.gmra.mxu0 %v2770_v10 }
 0x2fb   :  { %10331 = vmatpush3.xpose.msra.mxu0 %v2812_v0  ;;  %10332 = vmatprep.mubr.msk.f32.mxu0 %vm11050_vm1, %v11049_v50 }
 0x2fc   :  { %10340 = vmatprep.subr.mxu0 %v11049_v50 }
 0x2fe   :  { %10333 = vmatmul.mubr.f32.vlgmr.msra.gmra.mxu0 %v2769_v3  ;;  %v3622_v3 = vpop.permute.xlu0 %3621 }
 0x2ff   :  { %10341 = vmatpush3.msra.mxu0 %v11473_v7  ;;  %10342 = vmatprep.mubr.msk.f32.mxu0 %vm11050_vm1, %v11049_v50  ;;  %v3625_v4 = vsel %vm1781_vm2, %v3622_v3, 0 }
 0x300   :  { %10350 = vmatprep.subr.mxu0 %v11049_v50  ;;  %v3658_v6 = vand.u32 4294901760, %v3625_v4 }
 0x302   :  { %v11532_v8 = vsub.f32 %v3625_v4, %v3658_v6  ;;  %v3620_v5 = vpop.permute.xlu0 %3619 }
 0x304   :  { %v3736_v12 = vand.u32 4294901760, %v11532_v8 }
 0x3a2   :  { %v2394_v21 = vpop.f32.mrf.mxu1 }
 0x3a4   :  { %v10289_v22 = vpop.f32.mrf.mxu1 }
 0x3a6   :  { %v2542_v23 = vpop.f32.mrf.mxu1 }
 0x3a8   :  { %v10299_v24 = vpop.f32.mrf.mxu1 }
 0x3aa   :  { %v2318_v25 = vpop.f32.mrf.mxu0  ;;  %v2688_v26 = vpop.f32.mrf.mxu1 }
 0x3ab   :  { %v2395_v27 = vadd.f32 %v2394_v21, %v2318_v25  ;;  %v3737_v21 = vsub.f32 %v11532_v8, %v3736_v12 }
 0x3ac   :  { %v10284_v28 = vpop.f32.mrf.mxu0  ;;  %v10309_v30 = vpop.f32.mrf.mxu1 }
 0x3ae   :  { %v2468_v31 = vpop.f32.mrf.mxu0  ;;  %v2851_v32 = vpop.f32.mrf.mxu1 }
 0x3af   :  { %v2469_v33 = vadd.f32 %v2468_v31, %v2395_v27 }
 0x3b0   :  { %v10294_v34 = vpop.f32.mrf.mxu0  ;;  %v10319_v35 = vpop.f32.mrf.mxu1 }
 0x3b1   :  { %v2543_v36 = vadd.f32 %v2542_v23, %v2469_v33 }
 0x3b2   :  { %v2616_v37 = vpop.f32.mrf.mxu0  ;;  %v2999_v38 = vpop.f32.mrf.mxu1 }
 0x3b3   :  { %v2617_v39 = vadd.f32 %v2616_v37, %v2543_v36 }
 0x3b4   :  { %v10304_v40 = vpop.f32.mrf.mxu0  ;;  %v10329_v41 = vpop.f32.mrf.mxu1 }
 0x3b5   :  { %v11521_v42 = vadd.f32 %v2688_v26, %v2617_v39  ;;  %v3738_v26 = vand.u32 4294901760, %v3737_v21 }
 0x3b6   :  { %v2775_v44 = vpop.f32.mrf.mxu0  ;;  %v3145_v45 = vpop.f32.mrf.mxu1 }
 0x3b7   :  { %v2776_v47 = vadd.f32 %v2775_v44, %v11447_v29 }
 0x3b8   :  { %v10314_v48 = vpop.f32.mrf.mxu0  ;;  %v10339_v49 = vpop.f32.mrf.mxu1 }
 0x3b9   :  { %v2852_v51 = vadd.f32 %v2851_v32, %v2776_v47 }
 0x3ba   :  { %v2925_v53 = vpop.f32.mrf.mxu0 }
 0x3bb   :  { %v2926_v55 = vadd.f32 %v2925_v53, %v2852_v51 }
 0x3bc   :  { %v10324_v56 = vpop.f32.mrf.mxu0 }
 0x3bd   :  { %v3000_v57 = vadd.f32 %v2999_v38, %v2926_v55 }
 0x3be   :  { %v3073_v58 = vpop.f32.mrf.mxu0 }
 0x3bf   :  { %v3074_v60 = vadd.f32 %v3073_v58, %v3000_v57 }
 0x3c0   :  { %v10334_v61 = vpop.f32.mrf.mxu0 }
 0x3c1   :  { %v3146_v62 = vadd.f32 %v3145_v45, %v3074_v60 }
 0x3c3   :  { %v3149_v63 = vsel %vm1781_vm2, %v3146_v62, -inf }
 0x3c4   :  { %3150 = vmax.xlane.f32.xlu1 %v3149_v63 }
 0x3d5   :  { %4082 = vrot.lane.b32.xlu1 %v11430_v20, %s11052_s26 }
 0x3d9   :  { %4544 = vrot.lane.b32.xlu1 %v11404_v46, %s11053_s3 }
 0x3dd   :  { %4542 = vrot.lane.b32.xlu1 %v11396_v19, %s11053_s3  ;;  %v3623_v19 = vsel %vm1781_vm2, %v3620_v5, 0 }
 0x3de   :  { %v3693_v16 = vand.u32 4294901760, %v3623_v19 }
 0x3e0   :  { %v3694_v24 = vsub.f32 %v3623_v19, %v3693_v16 }
 0x3e2   :  { %v3695_v28 = vand.u32 4294901760, %v3694_v24 }
 0x3e4   :  { %v3696_v30 = vsub.f32 %v3694_v24, %v3695_v28 }
 0x44d   :  { %v3151_v0 = vpop.xlane.xlu1 %3150 }
 0x44e   :  { %v3152_v1 = vsub.f32 %v3146_v62, %v3151_v0 }
 0x450   :  { %v3153_v2 = vmul.f32 1.442695, %v3152_v1 }
 0x451   :  { %v4083_v15 = vpop.permute.xlu1 %4082 }
 0x452   :  { %10816 = vpow2.f32 %v3153_v2  ;;  %v11545_v22 = vand.u32 4294901760, %v4083_v15 }
 0x454   :  { %v11552_v27 = vsub.f32 %v4083_v15, %v11545_v22 }
 0x45f   :  { %v11534_v10 = vpop.eup %10816 }
 0x460   :  { %v3163_v11 = vsel %vm1781_vm2, %v11534_v10, 0 }
 0x461   :  { %v3231_v46 = vand.u32 4294901760, %v3163_v11 }
 0x463   :  { %v3232_v54 = vsub.f32 %v3163_v11, %v3231_v46  ;;  %10348 = vmatmul.mubr.f32.vlgmr.msra.gmra.mxu1 %v3231_v46 }
 0x464   :  { %10356 = vmatpush3.msra.mxu1 %v11473_v7  ;;  %10357 = vmatprep.mubr.msk.f32.mxu1 %vm11050_vm1, %v11049_v50 }
 0x465   :  { %10365 = vmatprep.subr.mxu1 %v11049_v50  ;;  %v3233_v18 = vand.u32 4294901760, %v3232_v54 }
 0x467   :  { %10358 = vmatmul.mubr.f32.vlgmr.msra.gmra.mxu1 %v3233_v18  ;;  %v3234_v23 = vsub.f32 %v3232_v54, %v3233_v18 }
 0x468   :  { %10366 = vmatpush3.msra.mxu1 %v11473_v7  ;;  %10367 = vmatprep.mubr.msk.f32.mxu1 %vm11050_vm1, %v11049_v50  ;;  %v4197_v7 = vand.u32 4294901760, %v11552_v27 }
 0x469   :  { %10375 = vmatprep.subr.mxu1 %v11049_v50  ;;  %v3235_v25 = vand.u32 4294901760, %v3234_v23 }
 0x46a   :  { %v4198_v31 = vsub.f32 %v11552_v27, %v4197_v7 }
 0x46b   :  { %10343 = vmatmul.mubr.f32.vlgmr.msra.gmra.mxu0 %v3235_v25  ;;  %10368 = vmatmul.mubr.f32.vlgmr.msra.gmra.mxu1 %v3231_v46 }
 0x46c   :  { %10351 = vmatpush3.msra.mxu0 %v11480_v9  ;;  %10376 = vmatpush3.xpose.msra.mxu1 %v3738_v26  ;;  %v3697_v9 = vand.u32 4294901760, %v3696_v30 }
 0x46d   :  { %10352 = vmatprep.mubr.msk.f32.mxu0 %vm11050_vm1, %v11049_v50  ;;  %10360 = vmatprep.subr.mxu0 %v11049_v50 }
 0x46e   :  { %10377 = vmatprep.mubr.msk.f32.mxu1 %vm11050_vm1, %v11049_v50  ;;  %10385 = vmatprep.subr.mxu1 %v11049_v50 }
 0x46f   :  { %10353 = vmatmul.mubr.f32.vlgmr.msra.gmra.mxu0 %v3232_v54  ;;  %10378 = vmatmul.mubr.f32.vlgmr.msra.gmra.mxu1 %v3693_v16 }
 0x470   :  { %10361 = vmatpush3.msra.mxu0 %v3274_v13  ;;  %10386 = vmatpush3.xpose.msra.mxu1 %v3658_v6  ;;  %v4199_v13 = vand.u32 4294901760, %v4198_v31 }
 0x471   :  { %10362 = vmatprep.mubr.msk.f32.mxu0 %vm11050_vm1, %v11049_v50  ;;  %10370 = vmatprep.subr.mxu0 %v11049_v50 }
 0x472   :  { %10387 = vmatprep.mubr.msk.f32.mxu1 %vm11050_vm1, %v11049_v50  ;;  %10395 = vmatprep.subr.mxu1 %v11049_v50 }
 0x473   :  { %10363 = vmatmul.mubr.f32.vlgmr.msra.gmra.mxu0 %v3231_v46  ;;  %10388 = vmatmul.mubr.f32.vlgmr.msra.gmra.mxu1 %v3695_v28 }
 0x474   :  { %10371 = vmatpush3.xpose.msra.mxu0 %v3658_v6  ;;  %10396 = vmatpush3.xpose.msra.mxu1 %v3658_v6 }
 0x475   :  { %10372 = vmatprep.mubr.msk.f32.mxu0 %vm11050_vm1, %v11049_v50  ;;  %10380 = vmatprep.subr.mxu0 %v11049_v50 }
 0x476   :  { %10397 = vmatprep.mubr.msk.f32.mxu1 %vm11050_vm1, %v11049_v50  ;;  %10405 = vmatprep.subr.mxu1 %v11049_v50 }
 0x477   :  { %10373 = vmatmul.mubr.f32.vlgmr.msra.gmra.mxu0 %v3697_v9  ;;  %10398 = vmatmul.mubr.f32.vlgmr.msra.gmra.mxu1 %v3693_v16 }
 0x478   :  { %10381 = vmatpush3.xpose.msra.mxu0 %v11532_v8  ;;  %10406 = vmatpush3.msra.mxu1 %v4199_v13 }
 0x479   :  { %10382 = vmatprep.mubr.msk.f32.mxu0 %vm11050_vm1, %v11049_v50  ;;  %10390 = vmatprep.subr.mxu0 %v11049_v50 }
 0x47a   :  { %10407 = vmatprep.mubr.msk.f32.mxu1 %vm11050_vm1, %v11049_v50  ;;  %10415 = vmatprep.subr.mxu1 %v11049_v50 }
 0x47b   :  { %10383 = vmatmul.mubr.f32.vlgmr.msra.gmra.mxu0 %v3694_v24 }
 0x47c   :  { %10391 = vmatpush3.xpose.msra.mxu0 %v3736_v12  ;;  %10392 = vmatprep.mubr.msk.f32.mxu0 %vm11050_vm1, %v11049_v50 }
 0x47d   :  { %10400 = vmatprep.subr.mxu0 %v11049_v50 }
 0x47f   :  { %10393 = vmatmul.mubr.f32.vlgmr.msra.gmra.mxu0 %v3693_v16  ;;  %v4545_v16 = vpop.permute.xlu1 %4544 }
 0x480   :  { %10401 = vmatpush3.msra.mxu0 %v11545_v22  ;;  %10402 = vmatprep.mubr.msk.f32.mxu0 %vm11050_vm1, %v11049_v50  ;;  %v4548_v18 = vsel %vm1781_vm2, %v4545_v16, 0 }
 0x481   :  { %10410 = vmatprep.subr.mxu0 %v11049_v50  ;;  %v4581_v21 = vand.u32 4294901760, %v4548_v18 }
 0x483   :  { %v11600_v23 = vsub.f32 %v4548_v18, %v4581_v21  ;;  %v4543_v25 = vpop.permute.xlu1 %4542 }
 0x485   :  { %v4659_v30 = vand.u32 4294901760, %v11600_v23 }
 0x523   :  { %v3313_v32 = vpop.f32.mrf.mxu1 }
 0x525   :  { %v10349_v33 = vpop.f32.mrf.mxu1 }
 0x526   :  { %v4660_v33 = vsub.f32 %v11600_v23, %v4659_v30 }
 0x527   :  { %v3461_v34 = vpop.f32.mrf.mxu1 }
 0x529   :  { %v10359_v35 = vpop.f32.mrf.mxu1 }
 0x52b   :  { %v3237_v36 = vpop.f32.mrf.mxu0  ;;  %v3607_v37 = vpop.f32.mrf.mxu1 }
 0x52c   :  { %v3314_v38 = vadd.f32 %v3313_v32, %v3237_v36 }
 0x52d   :  { %v10344_v39 = vpop.f32.mrf.mxu0  ;;  %v10369_v40 = vpop.f32.mrf.mxu1 }
 0x52f   :  { %v3387_v41 = vpop.f32.mrf.mxu0  ;;  %v3775_v44 = vpop.f32.mrf.mxu1 }
 0x530   :  { %v3388_v45 = vadd.f32 %v3387_v41, %v3314_v38  ;;  %v4661_v38 = vand.u32 4294901760, %v4660_v33 }
 0x531   :  { %v10354_v47 = vpop.f32.mrf.mxu0  ;;  %v10379_v48 = vpop.f32.mrf.mxu1 }
 0x532   :  { %v3462_v49 = vadd.f32 %v3461_v34, %v3388_v45 }
 0x533   :  { %v3535_v51 = vpop.f32.mrf.mxu0  ;;  %v3923_v53 = vpop.f32.mrf.mxu1 }
 0x534   :  { %v3536_v55 = vadd.f32 %v3535_v51, %v3462_v49 }
 0x535   :  { %v10364_v56 = vpop.f32.mrf.mxu0  ;;  %v10389_v57 = vpop.f32.mrf.mxu1 }
 0x536   :  { %v11593_v58 = vadd.f32 %v3607_v37, %v3536_v55 }
 0x537   :  { %v3699_v60 = vpop.f32.mrf.mxu0  ;;  %v4069_v61 = vpop.f32.mrf.mxu1 }
 0x538   :  { %v3700_v62 = vadd.f32 %v3699_v60, %v11447_v29 }
 0x539   :  { %v10374_v63 = vpop.f32.mrf.mxu0  ;;  %v10399_v0 = vpop.f32.mrf.mxu1 }
 0x53a   :  { %v3776_v1 = vadd.f32 %v3775_v44, %v3700_v62 }
 0x53b   :  { %v3849_v2 = vpop.f32.mrf.mxu0 }
 0x53c   :  { %v3850_v3 = vadd.f32 %v3849_v2, %v3776_v1 }
 0x53d   :  { %v10384_v4 = vpop.f32.mrf.mxu0 }
 0x53e   :  { %v3924_v6 = vadd.f32 %v3923_v53, %v3850_v3 }
 0x53f   :  { %v3997_v8 = vpop.f32.mrf.mxu0 }
 0x540   :  { %v3998_v5 = vadd.f32 %v3997_v8, %v3924_v6 }
 0x541   :  { %v10394_v11 = vpop.f32.mrf.mxu0 }
 0x542   :  { %v4070_v46 = vadd.f32 %v4069_v61, %v3998_v5 }
 0x544   :  { %v4073_v12 = vsel %vm1781_vm2, %v4070_v46, -inf }
 0x545   :  { %4074 = vmax.xlane.f32.xlu0 %v4073_v12 }
 0x55b   :  { %5005 = vrot.lane.b32.xlu0 %v11430_v20, %s11053_s3  ;;  %v4546_v20 = vsel %vm1781_vm2, %v4543_v25, 0 }
 0x55c   :  { %v4616_v13 = vand.u32 4294901760, %v4546_v20 }
 0x55e   :  { %v4617_v36 = vsub.f32 %v4546_v20, %v4616_v13 }
 0x560   :  { %v4618_v40 = vand.u32 4294901760, %v4617_v36 }
 0x562   :  { %v4619_v41 = vsub.f32 %v4617_v36, %v4618_v40 }
 0x5ce   :  { %v4075_v19 = vpop.xlane.xlu0 %4074 }
 0x5cf   :  { %v4076_v15 = vsub.f32 %v4070_v46, %v4075_v19 }
 0x5d1   :  { %v4077_v54 = vmul.f32 1.442695, %v4076_v15 }
 0x5d2   :  { %v5006_v31 = vpop.permute.xlu0 %5005 }
 0x5d3   :  { %10818 = vpow2.f32 %v4077_v54  ;;  %v11613_v34 = vand.u32 4294901760, %v5006_v31 }
 0x5d5   :  { %v11620_v39 = vsub.f32 %v5006_v31, %v11613_v34  ;;  %v11668_v31 = vmul.f32 0.35355338, %v11393_v14 }
 0x5e0   :  { %v11602_v24 = vpop.eup %10818 }
 0x5e1   :  { %v4086_v26 = vsel %vm1781_vm2, %v11602_v24, 0 }
 0x5e2   :  { %v4154_v28 = vand.u32 4294901760, %v4086_v26 }
 0x5e4   :  { %v4155_v9 = vsub.f32 %v4086_v26, %v4154_v28  ;;  %10408 = vmatmul.mubr.f32.vlgmr.msra.gmra.mxu1 %v4154_v28 }
 0x5e5   :  { %10416 = vmatpush3.msra.mxu1 %v11545_v22  ;;  %10417 = vmatprep.mubr.msk.f32.mxu1 %vm11050_vm1, %v11049_v50 }
 0x5e6   :  { %10425 = vmatprep.subr.mxu1 %v11049_v50  ;;  %v4156_v32 = vand.u32 4294901760, %v4155_v9 }
 0x5e8   :  { %10418 = vmatmul.mubr.f32.vlgmr.msra.gmra.mxu1 %v4156_v32  ;;  %v4157_v35 = vsub.f32 %v4155_v9, %v4156_v32  ;;  %v5473_v32 = vsel %vm1781_vm2, %v11402_v43, 0 }
 0x5e9   :  { %10426 = vmatpush3.msra.mxu1 %v11545_v22  ;;  %10427 = vmatprep.mubr.msk.f32.mxu1 %vm11050_vm1, %v11049_v50  ;;  %v5120_v22 = vand.u32 4294901760, %v11620_v39  ;;  %v5506_v33 = vand.u32 4294901760, %v5473_v32 }
 0x5ea   :  { %10435 = vmatprep.subr.mxu1 %v11049_v50  ;;  %v4158_v37 = vand.u32 4294901760, %v4157_v35 }
 0x5eb   :  { %v5121_v44 = vsub.f32 %v11620_v39, %v5120_v22  ;;  %v11678_v35 = vsub.f32 %v5473_v32, %v5506_v33 }
 0x5ec   :  { %10403 = vmatmul.mubr.f32.vlgmr.msra.gmra.mxu0 %v4158_v37  ;;  %10428 = vmatmul.mubr.f32.vlgmr.msra.gmra.mxu1 %v4154_v28 }
 0x5ed   :  { %10411 = vmatpush3.msra.mxu0 %v11552_v27  ;;  %10436 = vmatpush3.xpose.msra.mxu1 %v4661_v38  ;;  %v4620_v27 = vand.u32 4294901760, %v4619_v41  ;;  %v5584_v38 = vand.u32 4294901760, %v11678_v35 }
 0x5ee   :  { %10412 = vmatprep.mubr.msk.f32.mxu0 %vm11050_vm1, %v11049_v50  ;;  %10420 = vmatprep.subr.mxu0 %v11049_v50 }
 0x5ef   :  { %10437 = vmatprep.mubr.msk.f32.mxu1 %vm11050_vm1, %v11049_v50  ;;  %10445 = vmatprep.subr.mxu1 %v11049_v50 }
 0x5f0   :  { %10413 = vmatmul.mubr.f32.vlgmr.msra.gmra.mxu0 %v4155_v9  ;;  %10438 = vmatmul.mubr.f32.vlgmr.msra.gmra.mxu1 %v4616_v13 }
 0x5f1   :  { %10421 = vmatpush3.msra.mxu0 %v4197_v7  ;;  %10446 = vmatpush3.xpose.msra.mxu1 %v4581_v21  ;;  %v5122_v7 = vand.u32 4294901760, %v5121_v44 }
 0x5f2   :  { %10422 = vmatprep.mubr.msk.f32.mxu0 %vm11050_vm1, %v11049_v50  ;;  %10430 = vmatprep.subr.mxu0 %v11049_v50 }
 0x5f3   :  { %10447 = vmatprep.mubr.msk.f32.mxu1 %vm11050_vm1, %v11049_v50  ;;  %10455 = vmatprep.subr.mxu1 %v11049_v50 }
 0x5f4   :  { %10423 = vmatmul.mubr.f32.vlgmr.msra.gmra.mxu0 %v4154_v28  ;;  %10448 = vmatmul.mubr.f32.vlgmr.msra.gmra.mxu1 %v4618_v40  ;;  %v5470_v40 = vsel %vm1781_vm2, %v11668_v31, 0 }
 0x5f5   :  { %10431 = vmatpush3.xpose.msra.mxu0 %v4581_v21  ;;  %10456 = vmatpush3.xpose.msra.mxu1 %v4581_v21 }
 0x5f6   :  { %10432 = vmatprep.mubr.msk.f32.mxu0 %vm11050_vm1, %v11049_v50  ;;  %10440 = vmatprep.subr.mxu0 %v11049_v50 }
 0x5f7   :  { %10457 = vmatprep.mubr.msk.f32.mxu1 %vm11050_vm1, %v11049_v50  ;;  %10465 = vmatprep.subr.mxu1 %v11049_v50 }
 0x5f8   :  { %10433 = vmatmul.mubr.f32.vlgmr.msra.gmra.mxu0 %v4620_v27  ;;  %10458 = vmatmul.mubr.f32.vlgmr.msra.gmra.mxu1 %v4616_v13  ;;  %v5541_v27 = vand.u32 4294901760, %v5470_v40 }
 0x5f9   :  { %10441 = vmatpush3.xpose.msra.mxu0 %v11600_v23  ;;  %10466 = vmatpush3.msra.mxu1 %v5122_v7  ;;  %v11692_v7 = vand.u32 4294901760, %v11428_v17 }
 0x5fa   :  { %10442 = vmatprep.mubr.msk.f32.mxu0 %vm11050_vm1, %v11049_v50  ;;  %10450 = vmatprep.subr.mxu0 %v11049_v50 }
 0x5fb   :  { %10467 = vmatprep.mubr.msk.f32.mxu1 %vm11050_vm1, %v11049_v50  ;;  %10475 = vmatprep.subr.mxu1 %v11049_v50 }
 0x5fc   :  { %10443 = vmatmul.mubr.f32.vlgmr.msra.gmra.mxu0 %v4617_v36 }
 0x5fd   :  { %10451 = vmatpush3.xpose.msra.mxu0 %v4659_v30  ;;  %10452 = vmatprep.mubr.msk.f32.mxu0 %vm11050_vm1, %v11049_v50 }
 0x5fe   :  { %10460 = vmatprep.subr.mxu0 %v11049_v50 }
 0x600   :  { %10453 = vmatmul.mubr.f32.vlgmr.msra.gmra.mxu0 %v4616_v13 }
 0x601   :  { %10461 = vmatpush3.msra.mxu0 %v11613_v34  ;;  %10462 = vmatprep.mubr.msk.f32.mxu0 %vm11050_vm1, %v11049_v50 }
 0x602   :  { %10470 = vmatprep.subr.mxu0 %v11049_v50 }
 0x6a4   :  { %v4236_v45 = vpop.f32.mrf.mxu1 }
 0x6a6   :  { %v10409_v47 = vpop.f32.mrf.mxu1 }
 0x6a8   :  { %v4384_v48 = vpop.f32.mrf.mxu1 }
 0x6aa   :  { %v10419_v49 = vpop.f32.mrf.mxu1 }
 0x6ab   :  { %v5542_v49 = vsub.f32 %v5470_v40, %v5541_v27 }
 0x6ac   :  { %v4160_v51 = vpop.f32.mrf.mxu0  ;;  %v4530_v53 = vpop.f32.mrf.mxu1 }
 0x6ad   :  { %v4237_v55 = vadd.f32 %v4236_v45, %v4160_v51  ;;  %v5585_v45 = vsub.f32 %v11678_v35, %v5584_v38 }
 0x6ae   :  { %v10404_v56 = vpop.f32.mrf.mxu0  ;;  %v10429_v57 = vpop.f32.mrf.mxu1 }
 0x6af   :  { %v5586_v51 = vand.u32 4294901760, %v5585_v45 }
 0x6b0   :  { %v4310_v60 = vpop.f32.mrf.mxu0  ;;  %v4698_v61 = vpop.f32.mrf.mxu1 }
 0x6b1   :  { %v4311_v62 = vadd.f32 %v4310_v60, %v4237_v55 }
 0x6b2   :  { %v10414_v63 = vpop.f32.mrf.mxu0  ;;  %v10439_v0 = vpop.f32.mrf.mxu1 }
 0x6b3   :  { %v4385_v1 = vadd.f32 %v4384_v48, %v4311_v62 }
 0x6b4   :  { %v4458_v2 = vpop.f32.mrf.mxu0  ;;  %v4846_v3 = vpop.f32.mrf.mxu1 }
 0x6b5   :  { %v4459_v4 = vadd.f32 %v4458_v2, %v4385_v1 }
 0x6b6   :  { %v10424_v6 = vpop.f32.mrf.mxu0  ;;  %v10449_v8 = vpop.f32.mrf.mxu1 }
 0x6b7   :  { %v11661_v5 = vadd.f32 %v4530_v53, %v4459_v4  ;;  %v11701_v53 = vsub.f32 %v11428_v17, %v11692_v7 }
 0x6b8   :  { %v4622_v11 = vpop.f32.mrf.mxu0  ;;  %v4992_v46 = vpop.f32.mrf.mxu1 }
 0x6b9   :  { %v4623_v12 = vadd.f32 %v4622_v11, %v11447_v29  ;;  %v6042_v55 = vand.u32 4294901760, %v11701_v53  ;;  %v5466_v11 = vld [vmem:[#allocation9 + $0x8] sm:$0xff] }
 0x6ba   :  { %v10434_v19 = vpop.f32.mrf.mxu0  ;;  %v10459_v15 = vpop.f32.mrf.mxu1  ;;  %vm5467_vm4 = vcmp.eq.f32.partialorder %v5466_v11, 0.0 }
 0x6bb   :  { %v4699_v54 = vadd.f32 %v4698_v61, %v4623_v12  ;;  %v6043_v57 = vsub.f32 %v11701_v53, %v6042_v55 }
 0x6bc   :  { %v4772_v16 = vpop.f32.mrf.mxu0 }
 0x6bd   :  { %v4773_v18 = vadd.f32 %v4772_v16, %v4699_v54 }
 0x6be   :  { %v10444_v21 = vpop.f32.mrf.mxu0 }
 0x6bf   :  { %v4847_v23 = vadd.f32 %v4846_v3, %v4773_v18 }
 0x6c0   :  { %v4920_v25 = vpop.f32.mrf.mxu0 }
 0x6c1   :  { %v4921_v26 = vadd.f32 %v4920_v25, %v4847_v23  ;;  %v11743_v25 = vsel %vm5467_vm4, -1e+09, %v11049_v50 }
 0x6c2   :  { %v10454_v28 = vpop.f32.mrf.mxu0 }
 0x6c3   :  { %v4993_v30 = vadd.f32 %v4992_v46, %v4921_v26 }
 0x6c5   :  { %v4996_v20 = vsel %vm1781_vm2, %v4993_v30, -inf }
 0x6c6   :  { %4997 = vmax.xlane.f32.xlu1 %v4996_v20 }
 0x6d7   :  { %6384 = vrot.lane.b32.xlu1 %v11402_v43, %s11051_s25 }
 0x6db   :  { %6382 = vrot.lane.b32.xlu1 %v11668_v31, %s11051_s25 }
 0x6df   :  { %6846 = vrot.lane.b32.xlu1 %v11428_v17, %s11051_s25 }
 0x6e3   :  { %7305 = vrot.lane.b32.xlu1 %v11668_v31, %s11052_s26 }
 0x74f   :  { %v4998_v29 = vpop.xlane.xlu1 %4997 }
 0x750   :  { %v4999_v9 = vsub.f32 %v4993_v30, %v4998_v29 }
 0x752   :  { %v5000_v13 = vmul.f32 1.442695, %v4999_v9 }
 0x754   :  { %10820 = vpow2.f32 %v5000_v13 }
 0x761   :  { %v11680_v14 = vpop.eup %10820 }
 0x762   :  { %v5009_v36 = vsel %vm1781_vm2, %v11680_v14, 0 }
 0x763   :  { %v5077_v37 = vand.u32 4294901760, %v5009_v36 }
 0x765   :  { %v5078_v41 = vsub.f32 %v5009_v36, %v5077_v37  ;;  %10468 = vmatmul.mubr.f32.vlgmr.msra.gmra.mxu1 %v5077_v37 }
 0x766   :  { %10476 = vmatpush3.msra.mxu1 %v11613_v34  ;;  %10477 = vmatprep.mubr.msk.f32.mxu1 %vm11050_vm1, %v11049_v50 }
 0x767   :  { %10485 = vmatprep.subr.mxu1 %v11049_v50  ;;  %v5079_v44 = vand.u32 4294901760, %v5078_v41 }
 0x769   :  { %10478 = vmatmul.mubr.f32.vlgmr.msra.gmra.mxu1 %v5079_v44  ;;  %v5080_v47 = vsub.f32 %v5078_v41, %v5079_v44 }
 0x76a   :  { %10486 = vmatpush3.msra.mxu1 %v11613_v34  ;;  %10487 = vmatprep.mubr.msk.f32.mxu1 %vm11050_vm1, %v11049_v50  ;;  %v5543_v34 = vand.u32 4294901760, %v5542_v49 }
 0x76b   :  { %10495 = vmatprep.subr.mxu1 %v11049_v50  ;;  %v5081_v48 = vand.u32 4294901760, %v5080_v47 }
 0x76c   :  { %v5544_v56 = vsub.f32 %v5542_v49, %v5543_v34 }
 0x76d   :  { %10463 = vmatmul.mubr.f32.vlgmr.msra.gmra.mxu0 %v5081_v48  ;;  %10488 = vmatmul.mubr.f32.vlgmr.msra.gmra.mxu1 %v5077_v37  ;;  %v6385_v48 = vpop.permute.xlu1 %6384 }
 0x76e   :  { %10471 = vmatpush3.msra.mxu0 %v11620_v39  ;;  %10496 = vmatpush3.xpose.msra.mxu1 %v5586_v51  ;;  %v5545_v39 = vand.u32 4294901760, %v5544_v56 }
 0x76f   :  { %10472 = vmatprep.mubr.msk.f32.mxu0 %vm11050_vm1, %v11049_v50  ;;  %10480 = vmatprep.subr.mxu0 %v11049_v50 }
 0x770   :  { %10497 = vmatprep.mubr.msk.f32.mxu1 %vm11050_vm1, %v11049_v50  ;;  %10505 = vmatprep.subr.mxu1 %v11049_v50 }
 0x771   :  { %10473 = vmatmul.mubr.f32.vlgmr.msra.gmra.mxu0 %v5078_v41  ;;  %10498 = vmatmul.mubr.f32.vlgmr.msra.gmra.mxu1 %v5541_v27 }
 0x772   :  { %10481 = vmatpush3.msra.mxu0 %v5120_v22  ;;  %10506 = vmatpush3.xpose.msra.mxu1 %v5506_v33  ;;  %v6044_v22 = vand.u32 4294901760, %v6043_v57 }
 0x773   :  { %10482 = vmatprep.mubr.msk.f32.mxu0 %vm11050_vm1, %v11049_v50  ;;  %10490 = vmatprep.subr.mxu0 %v11049_v50 }
 0x774   :  { %10507 = vmatprep.mubr.msk.f32.mxu1 %vm11050_vm1, %v11049_v50  ;;  %10515 = vmatprep.subr.mxu1 %v11049_v50 }
 0x775   :  { %10483 = vmatmul.mubr.f32.vlgmr.msra.gmra.mxu0 %v5077_v37  ;;  %10508 = vmatmul.mubr.f32.vlgmr.msra.gmra.mxu1 %v5543_v34  ;;  %v6383_v34 = vpop.permute.xlu1 %6382 }
 0x776   :  { %10491 = vmatpush3.xpose.msra.mxu0 %v5506_v33  ;;  %10516 = vmatpush3.xpose.msra.mxu1 %v5506_v33 }
 0x777   :  { %10492 = vmatprep.mubr.msk.f32.mxu0 %vm11050_vm1, %v11049_v50  ;;  %10500 = vmatprep.subr.mxu0 %v11049_v50 }
 0x778   :  { %10517 = vmatprep.mubr.msk.f32.mxu1 %vm11050_vm1, %v11049_v50  ;;  %10525 = vmatprep.subr.mxu1 %v11049_v50 }
 0x779   :  { %10493 = vmatmul.mubr.f32.vlgmr.msra.gmra.mxu0 %v5545_v39  ;;  %10518 = vmatmul.mubr.f32.vlgmr.msra.gmra.mxu1 %v5541_v27 }
 0x77a   :  { %10501 = vmatpush3.xpose.msra.mxu0 %v11678_v35  ;;  %10526 = vmatpush3.msra.mxu1 %v6044_v22 }
 0x77b   :  { %10502 = vmatprep.mubr.msk.f32.mxu0 %vm11050_vm1, %v11049_v50  ;;  %10510 = vmatprep.subr.mxu0 %v11049_v50 }
 0x77c   :  { %10527 = vmatprep.mubr.msk.f32.mxu1 %vm11050_vm1, %v11049_v50  ;;  %10535 = vmatprep.subr.mxu1 %v11049_v50 }
 0x77d   :  { %10503 = vmatmul.mubr.f32.vlgmr.msra.gmra.mxu0 %v5542_v49  ;;  %v6388_v49 = vsel %vm1781_vm2, %v6385_v48, 0 }
 0x77e   :  { %10511 = vmatpush3.xpose.msra.mxu0 %v5584_v38  ;;  %10512 = vmatprep.mubr.msk.f32.mxu0 %vm11050_vm1, %v11049_v50  ;;  %v6421_v51 = vand.u32 4294901760, %v6388_v49 }
 0x77f   :  { %10520 = vmatprep.subr.mxu0 %v11049_v50 }
 0x780   :  { %v11750_v56 = vsub.f32 %v6388_v49, %v6421_v51 }
 0x781   :  { %10513 = vmatmul.mubr.f32.vlgmr.msra.gmra.mxu0 %v5541_v27 }
 0x782   :  { %10521 = vmatpush3.msra.mxu0 %v11692_v7  ;;  %10522 = vmatprep.mubr.msk.f32.mxu0 %vm11050_vm1, %v11049_v50 }
 0x783   :  { %10530 = vmatprep.subr.mxu0 %v11049_v50 }
 0x825   :  { %v5159_v60 = vpop.f32.mrf.mxu1 }
 0x827   :  { %v10469_v61 = vpop.f32.mrf.mxu1 }
 0x828   :  { %v6386_v61 = vsel %vm1781_vm2, %v6383_v34, 0 }
 0x829   :  { %v5307_v62 = vpop.f32.mrf.mxu1 }
 0x82b   :  { %v10479_v63 = vpop.f32.mrf.mxu1 }
 0x82d   :  { %v5083_v0 = vpop.f32.mrf.mxu0  ;;  %v5453_v1 = vpop.f32.mrf.mxu1 }
 0x82e   :  { %v5160_v2 = vadd.f32 %v5159_v60, %v5083_v0  ;;  %v6499_v60 = vand.u32 4294901760, %v11750_v56  ;;  %v6456_v0 = vand.u32 4294901760, %v6386_v61 }
 0x82f   :  { %v10464_v3 = vpop.f32.mrf.mxu0  ;;  %v10489_v4 = vpop.f32.mrf.mxu1 }
 0x831   :  { %v5233_v6 = vpop.f32.mrf.mxu0  ;;  %v5623_v8 = vpop.f32.mrf.mxu1 }
 0x832   :  { %v5234_v46 = vadd.f32 %v5233_v6, %v5160_v2  ;;  %v6500_v2 = vsub.f32 %v11750_v56, %v6499_v60  ;;  %v6457_v6 = vsub.f32 %v6386_v61, %v6456_v0 }
 0x833   :  { %v10474_v12 = vpop.f32.mrf.mxu0  ;;  %v10499_v19 = vpop.f32.mrf.mxu1 }
 0x834   :  { %v5308_v15 = vadd.f32 %v5307_v62, %v5234_v46  ;;  %v6847_v62 = vpop.permute.xlu1 %6846  ;;  %v6501_v11 = vand.u32 4294901760, %v6500_v2  ;;  %v6458_v12 = vand.u32 4294901760, %v6457_v6 }
 0x835   :  { %v5381_v54 = vpop.f32.mrf.mxu0  ;;  %v5771_v16 = vpop.f32.mrf.mxu1  ;;  %v11763_v3 = vand.u32 4294901760, %v6847_v62 }
 0x836   :  { %v5382_v18 = vadd.f32 %v5381_v54, %v5308_v15  ;;  %v6459_v19 = vsub.f32 %v6457_v6, %v6458_v12 }
 0x837   :  { %v10484_v21 = vpop.f32.mrf.mxu0  ;;  %v10509_v23 = vpop.f32.mrf.mxu1  ;;  %v11770_v46 = vsub.f32 %v6847_v62, %v11763_v3 }
 0x838   :  { %v11745_v26 = vadd.f32 %v5453_v1, %v5382_v18 }
 0x839   :  { %v5547_v28 = vpop.f32.mrf.mxu0  ;;  %v5917_v30 = vpop.f32.mrf.mxu1 }
 0x83a   :  { %v5548_v20 = vadd.f32 %v5547_v28, %v11743_v25 }
 0x83b   :  { %v10494_v29 = vpop.f32.mrf.mxu0  ;;  %v10519_v9 = vpop.f32.mrf.mxu1 }
 0x83c   :  { %v5624_v13 = vadd.f32 %v5623_v8, %v5548_v20 }
 0x83d   :  { %v5697_v32 = vpop.f32.mrf.mxu0 }
 0x83e   :  { %v5698_v33 = vadd.f32 %v5697_v32, %v5624_v13 }
 0x83f   :  { %v10504_v35 = vpop.f32.mrf.mxu0 }
 0x840   :  { %v5772_v36 = vadd.f32 %v5771_v16, %v5698_v33 }
 0x841   :  { %v5845_v37 = vpop.f32.mrf.mxu0 }
 0x842   :  { %v5846_v38 = vadd.f32 %v5845_v37, %v5772_v36 }
 0x843   :  { %v10514_v40 = vpop.f32.mrf.mxu0 }
 0x844   :  { %v5918_v41 = vadd.f32 %v5917_v30, %v5846_v38 }
 0x846   :  { %v5921_v44 = vsel %vm1781_vm2, %v5918_v41, -inf }
 0x847   :  { %5922 = vmax.xlane.f32.xlu0 %v5921_v44 }
 0x8d0   :  { %v5923_v27 = vpop.xlane.xlu0 %5922 }
 0x8d1   :  { %v5924_v45 = vsub.f32 %v5918_v41, %v5923_v27 }
 0x8d3   :  { %v5925_v47 = vmul.f32 1.442695, %v5924_v45 }
 0x8d5   :  { %10822 = vpow2.f32 %v5925_v47 }
 0x8e2   :  { %v11752_v57 = vpop.eup %10822 }
 0x8e3   :  { %v5931_v39 = vsel %vm1781_vm2, %v11752_v57, 0 }
 0x8e4   :  { %v5999_v22 = vand.u32 4294901760, %v5931_v39 }
 0x8e6   :  { %v6000_v63 = vsub.f32 %v5931_v39, %v5999_v22  ;;  %10528 = vmatmul.mubr.f32.vlgmr.msra.gmra.mxu1 %v5999_v22 }
 0x8e7   :  { %10536 = vmatpush3.msra.mxu1 %v11692_v7  ;;  %10537 = vmatprep.mubr.msk.f32.mxu1 %vm11050_vm1, %v11049_v50 }
 0x8e8   :  { %10545 = vmatprep.subr.mxu1 %v11049_v50  ;;  %v6001_v1 = vand.u32 4294901760, %v6000_v63 }
 0x8ea   :  { %10538 = vmatmul.mubr.f32.vlgmr.msra.gmra.mxu1 %v6001_v1  ;;  %v6002_v4 = vsub.f32 %v6000_v63, %v6001_v1 }
 0x8eb   :  { %10546 = vmatpush3.msra.mxu1 %v11692_v7  ;;  %10547 = vmatprep.mubr.msk.f32.mxu1 %vm11050_vm1, %v11049_v50  ;;  %v6961_v7 = vand.u32 4294901760, %v11770_v46 }
 0x8ec   :  { %10555 = vmatprep.subr.mxu1 %v11049_v50  ;;  %v6003_v8 = vand.u32 4294901760, %v6002_v4 }
 0x8ed   :  { %v6962_v15 = vsub.f32 %v11770_v46, %v6961_v7 }
 0x8ee   :  { %10523 = vmatmul.mubr.f32.vlgmr.msra.gmra.mxu0 %v6003_v8  ;;  %10548 = vmatmul.mubr.f32.vlgmr.msra.gmra.mxu1 %v5999_v22 }
 0x8ef   :  { %10531 = vmatpush3.msra.mxu0 %v11701_v53  ;;  %10556 = vmatpush3.xpose.msra.mxu1 %v6501_v11  ;;  %v6460_v53 = vand.u32 4294901760, %v6459_v19 }
 0x8f0   :  { %10532 = vmatprep.mubr.msk.f32.mxu0 %vm11050_vm1, %v11049_v50  ;;  %10540 = vmatprep.subr.mxu0 %v11049_v50 }
 0x8f1   :  { %10557 = vmatprep.mubr.msk.f32.mxu1 %vm11050_vm1, %v11049_v50  ;;  %10565 = vmatprep.subr.mxu1 %v11049_v50 }
 0x8f2   :  { %10533 = vmatmul.mubr.f32.vlgmr.msra.gmra.mxu0 %v6000_v63  ;;  %10558 = vmatmul.mubr.f32.vlgmr.msra.gmra.mxu1 %v6456_v0 }
 0x8f3   :  { %10541 = vmatpush3.msra.mxu0 %v6042_v55  ;;  %10566 = vmatpush3.xpose.msra.mxu1 %v6421_v51  ;;  %v6963_v55 = vand.u32 4294901760, %v6962_v15 }
 0x8f4   :  { %10542 = vmatprep.mubr.msk.f32.mxu0 %vm11050_vm1, %v11049_v50  ;;  %10550 = vmatprep.subr.mxu0 %v11049_v50 }
 0x8f5   :  { %10567 = vmatprep.mubr.msk.f32.mxu1 %vm11050_vm1, %v11049_v50  ;;  %10575 = vmatprep.subr.mxu1 %v11049_v50 }
 0x8f6   :  { %10543 = vmatmul.mubr.f32.vlgmr.msra.gmra.mxu0 %v5999_v22  ;;  %10568 = vmatmul.mubr.f32.vlgmr.msra.gmra.mxu1 %v6458_v12 }
 0x8f7   :  { %10551 = vmatpush3.xpose.msra.mxu0 %v6421_v51  ;;  %10576 = vmatpush3.xpose.msra.mxu1 %v6421_v51 }
 0x8f8   :  { %10552 = vmatprep.mubr.msk.f32.mxu0 %vm11050_vm1, %v11049_v50  ;;  %10560 = vmatprep.subr.mxu0 %v11049_v50 }
 0x8f9   :  { %10577 = vmatprep.mubr.msk.f32.mxu1 %vm11050_vm1, %v11049_v50  ;;  %10585 = vmatprep.subr.mxu1 %v11049_v50 }
 0x8fa   :  { %10553 = vmatmul.mubr.f32.vlgmr.msra.gmra.mxu0 %v6460_v53  ;;  %10578 = vmatmul.mubr.f32.vlgmr.msra.gmra.mxu1 %v6456_v0  ;;  %v7306_v53 = vpop.permute.xlu1 %7305 }
 0x8fb   :  { %10561 = vmatpush3.xpose.msra.mxu0 %v11750_v56  ;;  %10586 = vmatpush3.msra.mxu1 %v6963_v55 }
 0x8fc   :  { %10562 = vmatprep.mubr.msk.f32.mxu0 %vm11050_vm1, %v11049_v50  ;;  %10570 = vmatprep.subr.mxu0 %v11049_v50 }
 0x8fd   :  { %10587 = vmatprep.mubr.msk.f32.mxu1 %vm11050_vm1, %v11049_v50  ;;  %10595 = vmatprep.subr.mxu1 %v11049_v50 }
 0x8fe   :  { %10563 = vmatmul.mubr.f32.vlgmr.msra.gmra.mxu0 %v6457_v6 }
 0x8ff   :  { %10571 = vmatpush3.xpose.msra.mxu0 %v6499_v60  ;;  %10572 = vmatprep.mubr.msk.f32.mxu0 %vm11050_vm1, %v11049_v50 }
 0x900   :  { %10580 = vmatprep.subr.mxu0 %v11049_v50 }
 0x902   :  { %10573 = vmatmul.mubr.f32.vlgmr.msra.gmra.mxu0 %v6456_v0 }
 0x903   :  { %10581 = vmatpush3.msra.mxu0 %v11763_v3  ;;  %10582 = vmatprep.mubr.msk.f32.mxu0 %vm11050_vm1, %v11049_v50 }
 0x904   :  { %10590 = vmatprep.subr.mxu0 %v11049_v50 }
 0x9a6   :  { %v6081_v54 = vpop.f32.mrf.mxu1 }
 0x9a8   :  { %v10529_v16 = vpop.f32.mrf.mxu1 }
 0x9aa   :  { %v6229_v18 = vpop.f32.mrf.mxu1 }
 0x9ac   :  { %v10539_v21 = vpop.f32.mrf.mxu1 }
 0x9ae   :  { %v6005_v23 = vpop.f32.mrf.mxu0  ;;  %v6375_v28 = vpop.f32.mrf.mxu1 }
 0x9af   :  { %v6082_v30 = vadd.f32 %v6081_v54, %v6005_v23  ;;  %v7309_v54 = vsel %vm1781_vm2, %v7306_v53, 0 }
 0x9b0   :  { %v10524_v20 = vpop.f32.mrf.mxu0  ;;  %v10549_v29 = vpop.f32.mrf.mxu1  ;;  %v7379_v21 = vand.u32 4294901760, %v7309_v54 }
 0x9b2   :  { %v6155_v9 = vpop.f32.mrf.mxu0  ;;  %v6538_v13 = vpop.f32.mrf.mxu1  ;;  %v7380_v29 = vsub.f32 %v7309_v54, %v7379_v21 }
 0x9b3   :  { %v6156_v32 = vadd.f32 %v6155_v9, %v6082_v30 }
 0x9b4   :  { %v10534_v33 = vpop.f32.mrf.mxu0  ;;  %v10559_v35 = vpop.f32.mrf.mxu1 }
 0x9b5   :  { %v6230_v36 = vadd.f32 %v6229_v18, %v6156_v32  ;;  %v7381_v33 = vand.u32 4294901760, %v7380_v29 }
 0x9b6   :  { %v6303_v37 = vpop.f32.mrf.mxu0  ;;  %v6686_v38 = vpop.f32.mrf.mxu1 }
 0x9b7   :  { %v6304_v40 = vadd.f32 %v6303_v37, %v6230_v36  ;;  %v7382_v35 = vsub.f32 %v7380_v29, %v7381_v33 }
 0x9b8   :  { %v10544_v41 = vpop.f32.mrf.mxu0  ;;  %v10569_v44 = vpop.f32.mrf.mxu1 }
 0x9b9   :  { %v11811_v27 = vadd.f32 %v6375_v28, %v6304_v40 }
 0x9ba   :  { %v6462_v45 = vpop.f32.mrf.mxu0  ;;  %v6832_v47 = vpop.f32.mrf.mxu1 }
 0x9bb   :  { %v6463_v48 = vadd.f32 %v6462_v45, %v11743_v25 }
 0x9bc   :  { %v10554_v49 = vpop.f32.mrf.mxu0  ;;  %v10579_v51 = vpop.f32.mrf.mxu1 }
 0x9bd   :  { %v6539_v34 = vadd.f32 %v6538_v13, %v6463_v48 }
 0x9be   :  { %v6612_v56 = vpop.f32.mrf.mxu0 }
 0x9bf   :  { %v6613_v39 = vadd.f32 %v6612_v56, %v6539_v34 }
 0x9c0   :  { %v10564_v22 = vpop.f32.mrf.mxu0 }
 0x9c1   :  { %v6687_v60 = vadd.f32 %v6686_v38, %v6613_v39 }
 0x9c2   :  { %v6760_v61 = vpop.f32.mrf.mxu0 }
 0x9c3   :  { %v6761_v62 = vadd.f32 %v6760_v61, %v6687_v60 }
 0x9c4   :  { %v10574_v63 = vpop.f32.mrf.mxu0 }
 0x9c5   :  { %v6833_v0 = vadd.f32 %v6832_v47, %v6761_v62 }
 0x9c7   :  { %v6836_v1 = vsel %vm1781_vm2, %v6833_v0, -inf }
 0x9c8   :  { %6837 = vmax.xlane.f32.xlu0 %v6836_v1 }
 0x9de   :  { %7307 = vrot.lane.b32.xlu0 %v11402_v43, %s11052_s26 }
 0x9e2   :  { %7768 = vrot.lane.b32.xlu0 %v11428_v17, %s11052_s26 }
 0x9e6   :  { %8229 = vrot.lane.b32.xlu0 %v11402_v43, %s11053_s3 }
 0x9ea   :  { %8227 = vrot.lane.b32.xlu0 %v11668_v31, %s11053_s3 }
 0xa51   :  { %v6838_v2 = vpop.xlane.xlu0 %6837 }
 0xa52   :  { %v6839_v4 = vsub.f32 %v6833_v0, %v6838_v2 }
 0xa54   :  { %v6840_v6 = vmul.f32 1.442695, %v6839_v4 }
 0xa55   :  { %v7308_v8 = vpop.permute.xlu0 %7307 }
 0xa56   :  { %10824 = vpow2.f32 %v6840_v6  ;;  %v7311_v11 = vsel %vm1781_vm2, %v7308_v8, 0 }
 0xa57   :  { %v7344_v12 = vand.u32 4294901760, %v7311_v11 }
 0xa59   :  { %v11824_v19 = vsub.f32 %v7311_v11, %v7344_v12  ;;  %v7769_v16 = vpop.permute.xlu0 %7768 }
 0xa5a   :  { %v11837_v30 = vand.u32 4294901760, %v7769_v16 }
 0xa5b   :  { %v7422_v31 = vand.u32 4294901760, %v11824_v19 }
 0xa5c   :  { %v11844_v32 = vsub.f32 %v7769_v16, %v11837_v30 }
 0xa5d   :  { %v7423_v28 = vsub.f32 %v11824_v19, %v7422_v31 }
 0xa5f   :  { %v7424_v13 = vand.u32 4294901760, %v7423_v28  ;;  %v3155_v28 = vsel %vm1781_vm2, %v11534_v10, 0.0 }
 0xa63   :  { %v11826_v15 = vpop.eup %10824 }
 0xa64   :  { %v6850_v55 = vsel %vm1781_vm2, %v11826_v15, 0 }
 0xa65   :  { %v6918_v43 = vand.u32 4294901760, %v6850_v55 }
 0xa67   :  { %v6919_v18 = vsub.f32 %v6850_v55, %v6918_v43  ;;  %10588 = vmatmul.mubr.f32.vlgmr.msra.gmra.mxu1 %v6918_v43 }
 0xa68   :  { %10596 = vmatpush3.msra.mxu1 %v11763_v3  ;;  %10597 = vmatprep.mubr.msk.f32.mxu1 %vm11050_vm1, %v11049_v50 }
 0xa69   :  { %10605 = vmatprep.subr.mxu1 %v11049_v50  ;;  %v6920_v23 = vand.u32 4294901760, %v6919_v18 }
 0xa6b   :  { %10598 = vmatmul.mubr.f32.vlgmr.msra.gmra.mxu1 %v6920_v23  ;;  %v6921_v20 = vsub.f32 %v6919_v18, %v6920_v23 }
 0xa6c   :  { %10606 = vmatpush3.msra.mxu1 %v11763_v3  ;;  %10607 = vmatprep.mubr.msk.f32.mxu1 %vm11050_vm1, %v11049_v50  ;;  %v7883_v3 = vand.u32 4294901760, %v11844_v32 }
 0xa6d   :  { %10615 = vmatprep.subr.mxu1 %v11049_v50  ;;  %v6922_v9 = vand.u32 4294901760, %v6921_v20 }
 0xa6e   :  { %v7884_v36 = vsub.f32 %v11844_v32, %v7883_v3 }
 0xa6f   :  { %10583 = vmatmul.mubr.f32.vlgmr.msra.gmra.mxu0 %v6922_v9  ;;  %10608 = vmatmul.mubr.f32.vlgmr.msra.gmra.mxu1 %v6918_v43 }
 0xa70   :  { %10591 = vmatpush3.msra.mxu0 %v11770_v46  ;;  %10616 = vmatpush3.xpose.msra.mxu1 %v7424_v13  ;;  %v7383_v46 = vand.u32 4294901760, %v7382_v35  ;;  %v8230_v13 = vpop.permute.xlu0 %8229 }
 0xa71   :  { %10592 = vmatprep.mubr.msk.f32.mxu0 %vm11050_vm1, %v11049_v50  ;;  %10600 = vmatprep.subr.mxu0 %v11049_v50 }
 0xa72   :  { %10617 = vmatprep.mubr.msk.f32.mxu1 %vm11050_vm1, %v11049_v50  ;;  %10625 = vmatprep.subr.mxu1 %v11049_v50 }
 0xa73   :  { %10593 = vmatmul.mubr.f32.vlgmr.msra.gmra.mxu0 %v6919_v18  ;;  %10618 = vmatmul.mubr.f32.vlgmr.msra.gmra.mxu1 %v7379_v21 }
 0xa74   :  { %10601 = vmatpush3.msra.mxu0 %v6961_v7  ;;  %10626 = vmatpush3.xpose.msra.mxu1 %v7344_v12  ;;  %v7885_v7 = vand.u32 4294901760, %v7884_v36 }
 0xa75   :  { %10602 = vmatprep.mubr.msk.f32.mxu0 %vm11050_vm1, %v11049_v50  ;;  %10610 = vmatprep.subr.mxu0 %v11049_v50 }
 0xa76   :  { %10627 = vmatprep.mubr.msk.f32.mxu1 %vm11050_vm1, %v11049_v50  ;;  %10635 = vmatprep.subr.mxu1 %v11049_v50 }
 0xa77   :  { %10603 = vmatmul.mubr.f32.vlgmr.msra.gmra.mxu0 %v6918_v43  ;;  %10628 = vmatmul.mubr.f32.vlgmr.msra.gmra.mxu1 %v7381_v33  ;;  %v8233_v33 = vsel %vm1781_vm2, %v8230_v13, 0 }
 0xa78   :  { %10611 = vmatpush3.xpose.msra.mxu0 %v7344_v12  ;;  %10636 = vmatpush3.xpose.msra.mxu1 %v7344_v12  ;;  %v8266_v35 = vand.u32 4294901760, %v8233_v33 }
 0xa79   :  { %10612 = vmatprep.mubr.msk.f32.mxu0 %vm11050_vm1, %v11049_v50  ;;  %10620 = vmatprep.subr.mxu0 %v11049_v50 }
 0xa7a   :  { %10637 = vmatprep.mubr.msk.f32.mxu1 %vm11050_vm1, %v11049_v50  ;;  %10645 = vmatprep.subr.mxu1 %v11049_v50  ;;  %v11894_v36 = vsub.f32 %v8233_v33, %v8266_v35 }
 0xa7b   :  { %10613 = vmatmul.mubr.f32.vlgmr.msra.gmra.mxu0 %v7383_v46  ;;  %10638 = vmatmul.mubr.f32.vlgmr.msra.gmra.mxu1 %v7379_v21 }
 0xa7c   :  { %10621 = vmatpush3.xpose.msra.mxu0 %v11824_v19  ;;  %10646 = vmatpush3.msra.mxu1 %v7885_v7  ;;  %v8228_v7 = vpop.permute.xlu0 %8227  ;;  %v8344_v10 = vand.u32 4294901760, %v11894_v36 }
 0xa7d   :  { %10622 = vmatprep.mubr.msk.f32.mxu0 %vm11050_vm1, %v11049_v50  ;;  %10630 = vmatprep.subr.mxu0 %v11049_v50 }
 0xa7e   :  { %10647 = vmatprep.mubr.msk.f32.mxu1 %vm11050_vm1, %v11049_v50  ;;  %10655 = vmatprep.subr.mxu1 %v11049_v50 }
 0xa7f   :  { %10623 = vmatmul.mubr.f32.vlgmr.msra.gmra.mxu0 %v7380_v29 }
 0xa80   :  { %10631 = vmatpush3.xpose.msra.mxu0 %v7422_v31  ;;  %10632 = vmatprep.mubr.msk.f32.mxu0 %vm11050_vm1, %v11049_v50 }
 0xa81   :  { %10640 = vmatprep.subr.mxu0 %v11049_v50 }
 0xa83   :  { %10633 = vmatmul.mubr.f32.vlgmr.msra.gmra.mxu0 %v7379_v21 }
 0xa84   :  { %10641 = vmatpush3.msra.mxu0 %v11837_v30  ;;  %10642 = vmatprep.mubr.msk.f32.mxu0 %vm11050_vm1, %v11049_v50 }
 0xa85   :  { %10650 = vmatprep.subr.mxu0 %v11049_v50 }
 0xb27   :  { %v7000_v37 = vpop.f32.mrf.mxu1 }
 0xb29   :  { %v10589_v38 = vpop.f32.mrf.mxu1 }
 0xb2a   :  { %v8231_v38 = vsel %vm1781_vm2, %v8228_v7, 0 }
 0xb2b   :  { %v7148_v40 = vpop.f32.mrf.mxu1 }
 0xb2d   :  { %v10599_v41 = vpop.f32.mrf.mxu1 }
 0xb2f   :  { %v6924_v44 = vpop.f32.mrf.mxu0  ;;  %v7294_v45 = vpop.f32.mrf.mxu1 }
 0xb30   :  { %v7001_v47 = vadd.f32 %v7000_v37, %v6924_v44  ;;  %v8301_v44 = vand.u32 4294901760, %v8231_v38 }
 0xb31   :  { %v10584_v48 = vpop.f32.mrf.mxu0  ;;  %v10609_v49 = vpop.f32.mrf.mxu1 }
 0xb33   :  { %v7074_v51 = vpop.f32.mrf.mxu0  ;;  %v7461_v34 = vpop.f32.mrf.mxu1 }
 0xb34   :  { %v7075_v56 = vadd.f32 %v7074_v51, %v7001_v47  ;;  %v8345_v47 = vsub.f32 %v11894_v36, %v8344_v10  ;;  %v8302_v51 = vsub.f32 %v8231_v38, %v8301_v44 }
 0xb35   :  { %v10594_v39 = vpop.f32.mrf.mxu0  ;;  %v10619_v22 = vpop.f32.mrf.mxu1 }
 0xb36   :  { %v7149_v60 = vadd.f32 %v7148_v40, %v7075_v56  ;;  %v8346_v56 = vand.u32 4294901760, %v8345_v47  ;;  %v8303_v22 = vand.u32 4294901760, %v8302_v51  ;;  %v4079_v47 = vsel %vm1781_vm2, %v11602_v24, 0.0 }
 0xb37   :  { %v7222_v61 = vpop.f32.mrf.mxu0  ;;  %v7609_v62 = vpop.f32.mrf.mxu1 }
 0xb38   :  { %v7223_v63 = vadd.f32 %v7222_v61, %v7149_v60  ;;  %v8304_v60 = vsub.f32 %v8302_v51, %v8303_v22 }
 0xb39   :  { %v10604_v0 = vpop.f32.mrf.mxu0  ;;  %v10629_v1 = vpop.f32.mrf.mxu1 }
 0xb3a   :  { %v11885_v2 = vadd.f32 %v7294_v45, %v7223_v63 }
 0xb3b   :  { %v7385_v4 = vpop.f32.mrf.mxu0  ;;  %v7755_v6 = vpop.f32.mrf.mxu1 }
 0xb3c   :  { %v7386_v8 = vadd.f32 %v7385_v4, %v11743_v25 }
 0xb3d   :  { %v10614_v11 = vpop.f32.mrf.mxu0  ;;  %v10639_v12 = vpop.f32.mrf.mxu1 }
 0xb3e   :  { %v7462_v19 = vadd.f32 %v7461_v34, %v7386_v8 }
 0xb3f   :  { %v7535_v53 = vpop.f32.mrf.mxu0 }
 0xb40   :  { %v7536_v55 = vadd.f32 %v7535_v53, %v7462_v19 }
 0xb41   :  { %v10624_v43 = vpop.f32.mrf.mxu0 }
 0xb42   :  { %v7610_v54 = vadd.f32 %v7609_v62, %v7536_v55 }
 0xb43   :  { %v7683_v31 = vpop.f32.mrf.mxu0 }
 0xb44   :  { %v7684_v16 = vadd.f32 %v7683_v31, %v7610_v54 }
 0xb45   :  { %v10634_v18 = vpop.f32.mrf.mxu0 }
 0xb46   :  { %v7756_v21 = vadd.f32 %v7755_v6, %v7684_v16 }
 0xb48   :  { %v7759_v23 = vsel %vm1781_vm2, %v7756_v21, -inf }
 0xb49   :  { %7760 = vmax.xlane.f32.xlu1 %v7759_v23 }
 0xb5a   :  { %8690 = vrot.lane.b32.xlu1 %v11428_v17, %s11053_s3 }
 0xb7e   :  { %3156 = vadd.xlane.f32.xlu1 %v3155_v28 }
 0xbd2   :  { %v7761_v20 = vpop.xlane.xlu1 %7760 }
 0xbd3   :  { %v7762_v29 = vsub.f32 %v7756_v21, %v7761_v20 }
 0xbd5   :  { %v7763_v9 = vmul.f32 1.442695, %v7762_v29 }
 0xbd6   :  { %v8691_v40 = vpop.permute.xlu1 %8690 }
 0xbd7   :  { %10826 = vpow2.f32 %v7763_v9  ;;  %v11907_v48 = vand.u32 4294901760, %v8691_v40 }
 0xbd9   :  { %v11914_v39 = vsub.f32 %v8691_v40, %v11907_v48 }
 0xbe4   :  { %v11896_v46 = vpop.eup %10826 }
 0xbe5   :  { %v7772_v17 = vsel %vm1781_vm2, %v11896_v46, 0 }
 0xbe6   :  { %v7840_v37 = vand.u32 4294901760, %v7772_v17 }
 0xbe8   :  { %v7841_v41 = vsub.f32 %v7772_v17, %v7840_v37  ;;  %10648 = vmatmul.mubr.f32.vlgmr.msra.gmra.mxu1 %v7840_v37 }
 0xbe9   :  { %10656 = vmatpush3.msra.mxu1 %v11837_v30  ;;  %10657 = vmatprep.mubr.msk.f32.mxu1 %vm11050_vm1, %v11049_v50 }
 0xbea   :  { %10665 = vmatprep.subr.mxu1 %v11049_v50  ;;  %v7842_v45 = vand.u32 4294901760, %v7841_v41 }
 0xbec   :  { %10658 = vmatmul.mubr.f32.vlgmr.msra.gmra.mxu1 %v7842_v45  ;;  %v7843_v49 = vsub.f32 %v7841_v41, %v7842_v45 }
 0xbed   :  { %10666 = vmatpush3.msra.mxu1 %v11837_v30  ;;  %10667 = vmatprep.mubr.msk.f32.mxu1 %vm11050_vm1, %v11049_v50  ;;  %v8805_v30 = vand.u32 4294901760, %v11914_v39 }
 0xbee   :  { %10675 = vmatprep.subr.mxu1 %v11049_v50  ;;  %v7844_v34 = vand.u32 4294901760, %v7843_v49  ;;  %v5002_v49 = vsel %vm1781_vm2, %v11680_v14, 0.0 }
 0xbef   :  { %v8806_v61 = vsub.f32 %v11914_v39, %v8805_v30 }
 0xbf0   :  { %10643 = vmatmul.mubr.f32.vlgmr.msra.gmra.mxu0 %v7844_v34  ;;  %10668 = vmatmul.mubr.f32.vlgmr.msra.gmra.mxu1 %v7840_v37 }
 0xbf1   :  { %10651 = vmatpush3.msra.mxu0 %v11844_v32  ;;  %10676 = vmatpush3.xpose.msra.mxu1 %v8346_v56  ;;  %v8305_v32 = vand.u32 4294901760, %v8304_v60 }
 0xbf2   :  { %10652 = vmatprep.mubr.msk.f32.mxu0 %vm11050_vm1, %v11049_v50  ;;  %10660 = vmatprep.subr.mxu0 %v11049_v50 }
 0xbf3   :  { %10677 = vmatprep.mubr.msk.f32.mxu1 %vm11050_vm1, %v11049_v50  ;;  %10685 = vmatprep.subr.mxu1 %v11049_v50 }
 0xbf4   :  { %10653 = vmatmul.mubr.f32.vlgmr.msra.gmra.mxu0 %v7841_v41  ;;  %10678 = vmatmul.mubr.f32.vlgmr.msra.gmra.mxu1 %v8301_v44 }
 0xbf5   :  { %10661 = vmatpush3.msra.mxu0 %v7883_v3  ;;  %10686 = vmatpush3.xpose.msra.mxu1 %v8266_v35  ;;  %v8807_v3 = vand.u32 4294901760, %v8806_v61 }
 0xbf6   :  { %10662 = vmatprep.mubr.msk.f32.mxu0 %vm11050_vm1, %v11049_v50  ;;  %10670 = vmatprep.subr.mxu0 %v11049_v50 }
 0xbf7   :  { %10687 = vmatprep.mubr.msk.f32.mxu1 %vm11050_vm1, %v11049_v50  ;;  %10695 = vmatprep.subr.mxu1 %v11049_v50 }
 0xbf8   :  { %10663 = vmatmul.mubr.f32.vlgmr.msra.gmra.mxu0 %v7840_v37  ;;  %10688 = vmatmul.mubr.f32.vlgmr.msra.gmra.mxu1 %v8303_v22 }
 0xbf9   :  { %10671 = vmatpush3.xpose.msra.mxu0 %v8266_v35  ;;  %10696 = vmatpush3.xpose.msra.mxu1 %v8266_v35 }
 0xbfa   :  { %10672 = vmatprep.mubr.msk.f32.mxu0 %vm11050_vm1, %v11049_v50  ;;  %10680 = vmatprep.subr.mxu0 %v11049_v50 }
 0xbfb   :  { %10697 = vmatprep.mubr.msk.f32.mxu1 %vm11050_vm1, %v11049_v50  ;;  %10705 = vmatprep.subr.mxu1 %v11049_v50 }
 0xbfc   :  { %10673 = vmatmul.mubr.f32.vlgmr.msra.gmra.mxu0 %v8305_v32  ;;  %10698 = vmatmul.mubr.f32.vlgmr.msra.gmra.mxu1 %v8301_v44 }
 0xbfd   :  { %10681 = vmatpush3.xpose.msra.mxu0 %v11894_v36  ;;  %10706 = vmatpush3.msra.mxu1 %v8807_v3 }
 0xbfe   :  { %10682 = vmatprep.mubr.msk.f32.mxu0 %vm11050_vm1, %v11049_v50  ;;  %10690 = vmatprep.subr.mxu0 %v11049_v50 }
 0xbff   :  { %10707 = vmatprep.mubr.msk.f32.mxu1 %vm11050_vm1, %v11049_v50  ;;  %10715 = vmatprep.subr.mxu1 %v11049_v50 }
 0xc00   :  { %10683 = vmatmul.mubr.f32.vlgmr.msra.gmra.mxu0 %v8302_v51  ;;  %v7765_v51 = vsel %vm1781_vm2, %v11896_v46, 0.0 }
 0xc01   :  { %10691 = vmatpush3.xpose.msra.mxu0 %v8344_v10  ;;  %10692 = vmatprep.mubr.msk.f32.mxu0 %vm11050_vm1, %v11049_v50 }
 0xc02   :  { %10700 = vmatprep.subr.mxu0 %v11049_v50 }
 0xc04   :  { %10693 = vmatmul.mubr.f32.vlgmr.msra.gmra.mxu0 %v8301_v44 }
 0xc05   :  { %10701 = vmatpush3.msra.mxu0 %v11907_v48  ;;  %10702 = vmatprep.mubr.msk.f32.mxu0 %vm11050_vm1, %v11049_v50 }
 0xc06   :  { %10710 = vmatprep.subr.mxu0 %v11049_v50 }
 0xca8   :  { %v7922_v62 = vpop.f32.mrf.mxu1 }
 0xcaa   :  { %v10649_v63 = vpop.f32.mrf.mxu1 }
 0xcac   :  { %v8070_v0 = vpop.f32.mrf.mxu1 }
 0xcae   :  { %v10659_v1 = vpop.f32.mrf.mxu1 }
 0xcaf   :  { %v2240_v1 = vsel %vm1781_vm2, %v11462_v59, 0.0 }
 0xcb0   :  { %v7846_v4 = vpop.f32.mrf.mxu0  ;;  %v8216_v6 = vpop.f32.mrf.mxu1 }
 0xcb1   :  { %v7923_v8 = vadd.f32 %v7922_v62, %v7846_v4 }
 0xcb2   :  { %v10644_v11 = vpop.f32.mrf.mxu0  ;;  %v10669_v12 = vpop.f32.mrf.mxu1 }
 0xcb3   :  { %v5927_v11 = vsel %vm1781_vm2, %v11752_v57, 0.0  ;;  %v3157_v12 = vpop.xlane.xlu1 %3156 }
 0xcb4   :  { %v7996_v19 = vpop.f32.mrf.mxu0  ;;  %v8383_v53 = vpop.f32.mrf.mxu1 }
 0xcb5   :  { %v7997_v55 = vadd.f32 %v7996_v19, %v7923_v8 }
 0xcb6   :  { %v10654_v43 = vpop.f32.mrf.mxu0  ;;  %v10679_v54 = vpop.f32.mrf.mxu1 }
 0xcb7   :  { %v8071_v31 = vadd.f32 %v8070_v0, %v7997_v55 }
 0xcb8   :  { %v8144_v16 = vpop.f32.mrf.mxu0  ;;  %v8531_v18 = vpop.f32.mrf.mxu1 }
 0xcb9   :  { %v8145_v21 = vadd.f32 %v8144_v16, %v8071_v31 }
 0xcba   :  { %v10664_v23 = vpop.f32.mrf.mxu0  ;;  %v10689_v28 = vpop.f32.mrf.mxu1 }
 0xcbb   :  { %v11955_v20 = vadd.f32 %v8216_v6, %v8145_v21 }
 0xcbc   :  { %v8307_v29 = vpop.f32.mrf.mxu0  ;;  %v8677_v9 = vpop.f32.mrf.mxu1 }
 0xcbd   :  { %v8308_v13 = vadd.f32 %v8307_v29, %v11743_v25  ;;  %v6842_v25 = vsel %vm1781_vm2, %v11826_v15, 0.0 }
 0xcbe   :  { %v10674_v33 = vpop.f32.mrf.mxu0  ;;  %v10699_v35 = vpop.f32.mrf.mxu1 }
 0xcbf   :  { %v8384_v36 = vadd.f32 %v8383_v53, %v8308_v13 }
 0xcc0   :  { %v8457_v7 = vpop.f32.mrf.mxu0 }
 0xcc1   :  { %v8458_v17 = vadd.f32 %v8457_v7, %v8384_v36  ;;  %v9154_v36 = vld [vmem:[#allocation15 + $0x18] sm:$0xff] }
 0xcc2   :  { %v10684_v37 = vpop.f32.mrf.mxu0  ;;  %v12014_v7 = vand.u32 4294901760, %v9154_v36 }
 0xcc3   :  { %v8532_v10 = vadd.f32 %v8531_v18, %v8458_v17  ;;  %v9153_v37 = vld [vmem:[#allocation15 + $0x10] sm:$0xff] }
 0xcc4   :  { %v8605_v38 = vpop.f32.mrf.mxu0 }
 0xcc5   :  { %v8606_v40 = vadd.f32 %v8605_v38, %v8532_v10  ;;  %v12017_v10 = vsub.f32 %v9154_v36, %v12014_v7  ;;  %v12019_v38 = vand.u32 4294901760, %v9153_v37 }
 0xcc6   :  { %v10694_v41 = vpop.f32.mrf.mxu0 }
 0xcc7   :  { %v8678_v44 = vadd.f32 %v8677_v9, %v8606_v40  ;;  %v9152_v41 = vld [vmem:[#allocation15 + $0x8] sm:$0xff] }
 0xcc9   :  { %v8681_v45 = vsel %vm1781_vm2, %v8678_v44, -inf }
 0xcca   :  { %8682 = vmax.xlane.f32.xlu0 %v8681_v45  ;;  %v12027_v45 = vsub.f32 %v9153_v37, %v12019_v38 }
 0xcce   :  { %4080 = vadd.xlane.f32.xlu0 %v4079_v47  ;;  %v12029_v47 = vand.u32 4294901760, %v9152_v41 }
 0xcd2   :  { %6843 = vadd.xlane.f32.xlu0 %v6842_v25 }
 0xcd6   :  { %5003 = vadd.xlane.f32.xlu0 %v5002_v49  ;;  %v9151_v49 = vld [vmem:[#allocation15] sm:$0xff] }
 0xcda   :  { %7766 = vadd.xlane.f32.xlu0 %v7765_v51 }
 0xd53   :  { %v8683_v34 = vpop.xlane.xlu0 %8682 }
 0xd54   :  { %v8684_v56 = vsub.f32 %v8678_v44, %v8683_v34  ;;  %v12024_v44 = vand.u32 4294901760, %v12017_v10 }
 0xd56   :  { %v8685_v22 = vmul.f32 1.442695, %v8684_v56  ;;  %v9282_v34 = vsub.f32 %v12017_v10, %v12024_v44  ;;  %v12036_v56 = vand.u32 4294901760, %v12027_v45 }
 0xd57   :  { %v4081_v60 = vpop.xlane.xlu0 %4080 }
 0xd58   :  { %10828 = vpow2.f32 %v8685_v22  ;;  %v12039_v22 = vsub.f32 %v9152_v41, %v12029_v47 }
 0xd59   :  { %10830 = vrcp.f32 %v4081_v60 }
 0xd5b   :  { %v6844_v24 = vpop.xlane.xlu0 %6843 }
 0xd5c   :  { %10832 = vrcp.f32 %v6844_v24  ;;  %v12042_v24 = vand.u32 4294901760, %v9151_v49 }
 0xd5f   :  { %v5004_v61 = vpop.xlane.xlu0 %5003 }
 0xd60   :  { %10834 = vrcp.f32 %v5004_v61 }
 0xd61   :  { %10836 = vrcp.f32 %v3157_v12 }
 0xd63   :  { %v7767_v57 = vpop.xlane.xlu0 %7766 }
 0xd64   :  { %10838 = vrcp.f32 %v7767_v57 }
 0xd65   :  { %v10829_v15 = vpop.eup %10828 }
 0xd66   :  { %v10831_v32 = vpop.eup %10830  ;;  %v8687_v3 = vsel %vm1781_vm2, %v10829_v15, 0.0  ;;  %v8694_v14 = vsel %vm1781_vm2, %v10829_v15, 0 }
 0xd67   :  { %8688 = vadd.xlane.f32.xlu0 %v8687_v3  ;;  %v4535_v46 = vmul.f32 %v10831_v32, %v11661_v5  ;;  %v8762_v62 = vand.u32 4294901760, %v8694_v14  ;;  %v9283_v32 = vand.u32 4294901760, %v9282_v34  ;;  %v9289_v3 = vsub.f32 %v12027_v45, %v12036_v56 }
 0xd69   :  { %v10833_v63 = vpop.eup %10832  ;;  %4537 = vrot.lane.b32.xlu1 %v4535_v46, %s11054_s27  ;;  %v8763_v0 = vsub.f32 %v8694_v14, %v8762_v62  ;;  %10708 = vmatmul.mubr.f32.vlgmr.msra.gmra.mxu1 %v8762_v62  ;;  %v12048_v14 = vand.u32 4294901760, %v12039_v22 }
 0xd6a   :  { %10716 = vmatpush3.msra.mxu1 %v11907_v48  ;;  %10717 = vmatprep.mubr.msk.f32.mxu1 %vm11050_vm1, %v11049_v50  ;;  %v7299_v4 = vmul.f32 %v10833_v63, %v11885_v2 }
 0xd6b   :  { %2241 = vadd.xlane.f32.xlu0 %v2240_v1  ;;  %10725 = vmatprep.subr.mxu1 %v11049_v50  ;;  %v8764_v5 = vand.u32 4294901760, %v8763_v0  ;;  %v9296_v1 = vsub.f32 %v12039_v22, %v12048_v14 }
 0xd6d   :  { %v10835_v6 = vpop.eup %10834  ;;  %7301 = vrot.lane.b32.xlu1 %v7299_v4, %s11042_s15  ;;  %10718 = vmatmul.mubr.f32.vlgmr.msra.gmra.mxu1 %v8764_v5  ;;  %v8765_v8 = vsub.f32 %v8763_v0, %v8764_v5 }
 0xd6e   :  { %10726 = vmatpush3.msra.mxu1 %v11907_v48  ;;  %10727 = vmatprep.mubr.msk.f32.mxu1 %vm11050_vm1, %v11049_v50  ;;  %v5458_v59 = vmul.f32 %v10835_v6, %v11745_v26  ;;  %v10837_v26 = vpop.eup %10836 }
 0xd6f   :  { %5928 = vadd.xlane.f32.xlu0 %v5927_v11  ;;  %v8766_v2 = vand.u32 4294901760, %v8765_v8  ;;  %v3612_v48 = vmul.f32 %v10837_v26, %v11593_v58  ;;  %10741 = vmatprep.subr.mxu1 %v9283_v32  ;;  %v9297_v8 = vand.u32 4294901760, %v9296_v1 }
 0xd71   :  { %5460 = vrot.lane.b32.xlu1 %v5458_v59, %s11055_s28  ;;  %10703 = vmatmul.mubr.f32.vlgmr.msra.gmra.mxu0 %v8766_v2  ;;  %v10839_v19 = vpop.eup %10838 }
 0xd72   :  { %10711 = vmatpush3.msra.mxu0 %v11914_v39  ;;  %10728 = vmatmul.mubr.f32.vlgmr.msra.gmra.mxu1 %v8762_v62  ;;  %v8221_v53 = vmul.f32 %v10839_v19, %v11955_v20 }
 0xd73   :  { %10712 = vmatprep.mubr.msk.f32.mxu0 %vm11050_vm1, %v11049_v50  ;;  %10720 = vmatprep.subr.mxu0 %v11049_v50 }
 0xd74   :  { %10742 = vmatpush3.msra.mxu1 %v9283_v32 }
 0xd75   :  { %10713 = vmatmul.mubr.f32.vlgmr.msra.gmra.mxu0 %v8763_v0  ;;  %v9290_v0 = vand.u32 4294901760, %v9289_v3 }
 0xd76   :  { %10721 = vmatpush3.msra.mxu0 %v8805_v30  ;;  %10722 = vmatprep.mubr.msk.f32.mxu0 %vm11050_vm1, %v11049_v50 }
 0xd77   :  { %10730 = vmatprep.subr.mxu0 %v12014_v7  ;;  %10743 = vmatprep.subr.mxu1 %v9290_v0 }
 0xd78   :  { %10744 = vmatpush3.msra.mxu1 %v9290_v0 }
 0xd79   :  { %10723 = vmatmul.mubr.f32.vlgmr.msra.gmra.mxu0 %v8762_v62  ;;  %v12051_v62 = vsub.f32 %v9151_v49, %v12042_v24  ;;  %10745 = vmatprep.subr.mxu1 %v9297_v8 }
 0xd7a   :  { %10731 = vmatpush3.msra.mxu0 %v12014_v7  ;;  %10746 = vmatpush3.msra.mxu1 %v9297_v8 }
 0xd7b   :  { %10732 = vmatprep.subr.mxu0 %v12019_v38  ;;  %v12058_v5 = vand.u32 4294901760, %v12051_v62 }
 0xd7c   :  { %10733 = vmatpush3.msra.mxu0 %v12019_v38 }
 0xd7d   :  { %10734 = vmatprep.subr.mxu0 %v12029_v47  ;;  %v9303_v59 = vsub.f32 %v12051_v62, %v12058_v5 }
 0xd7e   :  { %10735 = vmatpush3.msra.mxu0 %v12029_v47 }
 0xd7f   :  { %10736 = vmatprep.subr.mxu0 %v12042_v24  ;;  %v9304_v57 = vand.u32 4294901760, %v9303_v59 }
 0xd80   :  { %10737 = vmatpush3.msra.mxu0 %v12042_v24 }
 0xd81   :  { %10752 = vmatprep.subr.mxu0 %v12017_v10  ;;  %10747 = vmatprep.subr.mxu1 %v9304_v57 }
 0xd82   :  { %10748 = vmatpush3.msra.mxu1 %v9304_v57 }
 0xd83   :  { %10763 = vmatprep.subr.mxu1 %v12014_v7 }
 0xd85   :  { %3614 = vrot.lane.b32.xlu0 %v3612_v48, %s11042_s15 }
 0xd89   :  { %8223 = vrot.lane.b32.xlu0 %v8221_v53, %s11054_s27 }
 0xddb   :  { %v4538_v30 = vpop.permute.xlu1 %4537 }
 0xddf   :  { %v7302_v54 = vpop.permute.xlu1 %7301 }
 0xde3   :  { %v5461_v18 = vpop.permute.xlu1 %5460 }
 0xdf0   :  { %v8689_v55 = vpop.xlane.xlu0 %8688 }
 0xdf4   :  { %v2242_v43 = vpop.xlane.xlu0 %2241 }
 0xdf5   :  { %10840 = vrcp.f32 %v2242_v43 }
 0xdf8   :  { %v5929_v39 = vpop.xlane.xlu0 %5928 }
 0xdf9   :  { %10842 = vrcp.f32 %v5929_v39 }
 0xdfa   :  { %10844 = vrcp.f32 %v8689_v55 }
 0xdfc   :  { %v3615_v58 = vpop.permute.xlu0 %3614 }
 0xe00   :  { %v8224_v23 = vpop.permute.xlu0 %8223 }
 0xe02   :  { %v10841_v50 = vpop.eup %10840 }
 0xe03   :  { %v2693_v31 = vmul.f32 %v10841_v50, %v11521_v42 }
 0xe05   :  { %2694 = vst.msk [vmem:[#allocation2] sm:$0xff] %vm1781_vm2, %v2693_v31 }
 0xe06   :  { %v10843_v16 = vpop.eup %10842  ;;  %3618 = vst.msk [vmem:[#allocation2] sm:$0xff] %vm3617_vm5, %v3615_v58  ;;  %v9157_v58 = vsub.s32 3, %v11383_v52 }
 0xe07   :  { %v6380_v21 = vmul.f32 %v10843_v16, %v11811_v27  ;;  %4541 = vst.msk [vmem:[#allocation2] sm:$0xff] %vm4540_vm6, %v4538_v30  ;;  %v10845_v48 = vpop.eup %10844 }
 0xe08   :  { %5464 = vst.msk [vmem:[#allocation2] sm:$0xff] %vm5463_vm7, %v5461_v18  ;;  %v10846_v18 = vld [vmem:[%s12122_s8] sm:$0xf]  ;;  %s11056_s8 = smov [#allocation17]  }
 0xe09   :  { %6381 = vst.msk [vmem:[#allocation2 + $0x8] sm:$0xff] %vm1781_vm2, %v6380_v21  ;;  %v9158_v21 = vrot.slane %v10846_v18, %v9157_v58  ;;  %s9700_s10 = sshll.u32 %s11056_s8, 4  ;;  %s9701_s10 = int_to_ptr.vmem [resolvable:$true] %s9700_s10 }
 0xe0a   :  { %7304 = vst.msk [vmem:[#allocation2 + $0x8] sm:$0xff] %vm3617_vm5, %v7302_v54  ;;  %s11007_s11 = scalar_lea.vmem %s9701_s10, 256  ;;  %p11012_p13 = scmp.lt.s32.totalorder %s9701_s10, %s9701_s10 }
 0xe0b   :  { %8226 = vst.msk [vmem:[#allocation2 + $0x8] sm:$0xff] %vm4540_vm6, %v8224_v23  ;;  %p11008_p12 = scmp.ne.s32.totalorder %s9701_s10, %s11007_s11  ;;  %p11013_p0 = scmp.lt.s32.totalorder %s11007_s11, %s11007_s11 }
 0xe0d   :  { %p11014_p1 = por %p11013_p0, %p11012_p13 }
 0xe0f   :  { %v9149_v42 = vld [vmem:[#allocation2] sm:$0xff]  ;;  %p11015_p2 = pnand %p11014_p1, %p11008_p12 }
 0xe10   :  { %v9160_v28 = vsel %vm153_vm0, %v9149_v42, 0 }
 0xe11   :  { %v12004_v20 = vand.u32 4294901760, %v9160_v28 }
 0xe13   :  { %10749 = vmatprep.mubr.f32.mxu1 %v12004_v20  ;;  %v12008_v29 = vsub.f32 %v9160_v28, %v12004_v20 }
 0xe15   :  { %v9236_v27 = vand.u32 4294901760, %v12008_v29 }
 0xe17   :  { %v9237_v9 = vsub.f32 %v12008_v29, %v9236_v27 }
 0xe19   :  { %v9238_v13 = vand.u32 4294901760, %v9237_v9 }
 0xe1b   :  { %10738 = vmatprep.mubr.f32.mxu0 %v9238_v13 }
 0xe29   :  { %v8844_v33 = vpop.f32.mrf.mxu1 }
 0xe2b   :  { %v10709_v35 = vpop.f32.mrf.mxu1 }
 0xe2d   :  { %v8992_v17 = vpop.f32.mrf.mxu1 }
 0xe2f   :  { %v10719_v40 = vpop.f32.mrf.mxu1 }
 0xe31   :  { %v8768_v25 = vpop.f32.mrf.mxu0 }
 0xe32   :  { %v9138_v51 = vpop.f32.mrf.mxu1  ;;  %v8845_v61 = vadd.f32 %v8844_v33, %v8768_v25 }
 0xe33   :  { %v10704_v60 = vpop.f32.mrf.mxu0 }
 0xe34   :  { %v10729_v15 = vpop.f32.mrf.mxu1 }
 0xe35   :  { %v8918_v46 = vpop.f32.mrf.mxu0 }
 0xe36   :  { %v8919_v63 = vadd.f32 %v8918_v46, %v8845_v61 }
 0xe37   :  { %v10714_v4 = vpop.f32.mrf.mxu0 }
 0xe38   :  { %v8993_v6 = vadd.f32 %v8992_v17, %v8919_v63 }
 0xe39   :  { %v9066_v11 = vpop.f32.mrf.mxu0 }
 0xe3a   :  { %v9067_v2 = vadd.f32 %v9066_v11, %v8993_v6 }
 0xe3b   :  { %v10724_v12 = vpop.f32.mrf.mxu0 }
 0xe3c   :  { %v9139_v26 = vadd.f32 %v9138_v51, %v9067_v2 }
 0xe3e   :  { %v9143_v19 = vmul.f32 %v10845_v48, %v9139_v26 }
 0xe40   :  { %9145 = vrot.lane.b32.xlu1 %v9143_v19, %s11055_s28 }
 0xeb2   :  { %v9146_v53 = vpop.permute.xlu1 %9145 }
 0xeb3   :  { %9148 = vst.msk [vmem:[#allocation2 + $0x8] sm:$0xff] %vm5463_vm7, %v9146_v53 }
 0xeba   :  { %v9150_v55 = vld [vmem:[#allocation2 + $0x8] sm:$0xff] }
 0xebb   :  { %v9163_v43 = vsel %vm153_vm0, %v9150_v55, 0 }
 0xebc   :  { %v9244_v39 = vand.u32 4294901760, %v9163_v43 }
 0xebe   :  { %v9245_v30 = vsub.f32 %v9163_v43, %v9244_v39  ;;  %10750 = vmatmul.mubr.f32.vlgmr.msra.gmra.mxu1 %v9244_v39 }
 0xebf   :  { %10764 = vmatpush3.msra.mxu1 %v12014_v7  ;;  %10771 = vmatprep.mubr.f32.mxu1 %v9236_v27 }
 0xec0   :  { %10765 = vmatprep.subr.mxu1 %v12019_v38  ;;  %v9246_v54 = vand.u32 4294901760, %v9245_v30 }
 0xec1   :  { %10766 = vmatpush3.msra.mxu1 %v12019_v38 }
 0xec2   :  { %10767 = vmatprep.subr.mxu1 %v12029_v47  ;;  %v9247_v50 = vsub.f32 %v9245_v30, %v9246_v54 }
 0xec3   :  { %10768 = vmatpush3.msra.mxu1 %v12029_v47 }
 0xec4   :  { %10769 = vmatprep.subr.mxu1 %v12042_v24  ;;  %v9248_v31 = vand.u32 4294901760, %v9247_v50 }
 0xec5   :  { %10770 = vmatpush3.msra.mxu1 %v12042_v24 }
 0xec6   :  { %10772 = vmatmul.mubr.f32.vlgmr.msra.gmra.mxu1 %v9246_v54  ;;  %10785 = vmatprep.subr.mxu1 %v12014_v7 }
 0xec7   :  { %10739 = vmatmul.mubr.f32.vlgmr.msra.gmra.mxu0 %v9248_v31  ;;  %10786 = vmatpush3.msra.mxu1 %v12014_v7 }
 0xec8   :  { %10753 = vmatpush3.msra.mxu0 %v12017_v10  ;;  %10793 = vmatprep.mubr.f32.mxu1 %v12004_v20 }
 0xec9   :  { %10754 = vmatprep.subr.mxu0 %v12027_v45  ;;  %10760 = vmatprep.mubr.f32.mxu0 %v12008_v29 }
 0xeca   :  { %10787 = vmatprep.subr.mxu1 %v12019_v38  ;;  %10755 = vmatpush3.msra.mxu0 %v12027_v45 }
 0xecb   :  { %10788 = vmatpush3.msra.mxu1 %v12019_v38  ;;  %10756 = vmatprep.subr.mxu0 %v12039_v22 }
 0xecc   :  { %10789 = vmatprep.subr.mxu1 %v12029_v47  ;;  %10757 = vmatpush3.msra.mxu0 %v12039_v22 }
 0xecd   :  { %10790 = vmatpush3.msra.mxu1 %v12029_v47  ;;  %10758 = vmatprep.subr.mxu0 %v12051_v62 }
 0xece   :  { %10791 = vmatprep.subr.mxu1 %v12042_v24  ;;  %10759 = vmatpush3.msra.mxu0 %v12051_v62 }
 0xecf   :  { %10792 = vmatpush3.msra.mxu1 %v12042_v24  ;;  %10761 = vmatmul.mubr.f32.vlgmr.msra.gmra.mxu0 %v9245_v30 }
 0xed0   :  { %10774 = vmatprep.subr.mxu0 %v12024_v44  ;;  %10794 = vmatmul.mubr.f32.vlgmr.msra.gmra.mxu1 %v9244_v39 }
 0xed1   :  { %10775 = vmatpush3.msra.mxu0 %v12024_v44  ;;  %10782 = vmatprep.mubr.f32.mxu0 %v12004_v20 }
 0xed2   :  { %10776 = vmatprep.subr.mxu0 %v12036_v56 }
 0xed3   :  { %10777 = vmatpush3.msra.mxu0 %v12036_v56 }
 0xed4   :  { %10778 = vmatprep.subr.mxu0 %v12048_v14 }
 0xed5   :  { %10779 = vmatpush3.msra.mxu0 %v12048_v14 }
 0xed6   :  { %10780 = vmatprep.subr.mxu0 %v12058_v5 }
 0xed7   :  { %10781 = vmatpush3.msra.mxu0 %v12058_v5 }
 0xed8   :  { %10783 = vmatmul.mubr.f32.vlgmr.msra.gmra.mxu0 %v9244_v39 }
 0xf7e   :  { %v10751_v23 = vpop.f32.mrf.mxu1 }
 0xf80   :  { %v9341_v27 = vpop.f32.mrf.mxu1 }
 0xf86   :  { %v10773_v13 = vpop.f32.mrf.mxu1 }
 0xf87   :  { %v10740_v16 = vpop.f32.mrf.mxu0 }
 0xf88   :  { %v9251_v28 = vadd.f32 %v10740_v16, %v9158_v21  ;;  %v9511_v17 = vpop.f32.mrf.mxu1 }
 0xf89   :  { %v9240_v42 = vpop.f32.mrf.mxu0 }
 0xf8a   :  { %v9241_v20 = vadd.f32 %v9240_v42, %v9158_v21  ;;  %v9348_v9 = vadd.f32 %v10751_v23, %v9251_v28 }
 0xf8c   :  { %v9342_v36 = vadd.f32 %v9341_v27, %v9241_v20 }
 0xf8f   :  { %v10762_v29 = vpop.f32.mrf.mxu0 }
 0xf90   :  { %v9435_v35 = vadd.f32 %v10762_v29, %v9348_v9  ;;  %v10795_v37 = vpop.f32.mrf.mxu1 }
 0xf91   :  { %v9427_v33 = vpop.f32.mrf.mxu0 }
 0xf92   :  { %v9428_v7 = vadd.f32 %v9427_v33, %v9342_v36  ;;  %v9520_v52 = vadd.f32 %v10773_v13, %v9435_v35  ;;  %v9683_v47 = vpop.f32.mrf.mxu1 }
 0xf94   :  { %v9512_v40 = vadd.f32 %v9511_v17, %v9428_v7 }
 0xf98   :  { %v10784_v10 = vpop.f32.mrf.mxu0 }
 0xf99   :  { %v9609_v38 = vadd.f32 %v10784_v10, %v9520_v52 }
 0xf9a   :  { %v9602_v41 = vpop.f32.mrf.mxu0 }
 0xf9b   :  { %v9690_v44 = vadd.f32 %v10795_v37, %v9609_v38  ;;  %v9603_v45 = vadd.f32 %v9602_v41, %v9512_v40 }
 0xf9d   :  { %9694 = vst.msk [vmem:[#allocation17 + $0x8] sm:$0xff] %vm153_vm0, %v9690_v44  ;;  %v9684_v25 = vadd.f32 %v9683_v47, %v9603_v45 }
 0xf9f   :  { %9693 = vst.msk [vmem:[#allocation17] sm:$0xff] %vm153_vm0, %v9684_v25 }
 0xfa0   :  { %11018 = shalt.err (!%p11015_p2)
}
 0xfa1   :  { %9706 = dma.vmem_to_hbm [thread:$0]  %s9701_s10, 256, %s12123_s9, [#allocation5], %s11041_s14, %s11041_s14, %s11042_s15  }
 0xfa2   :  { %11037 = dma.done.wait [#allocation5], 256  }
 0xfa3   :  { %11038 = vsyncadd [#allocation5], 4294967040 }
 0xfa4   :  { %9710 = vsyncpa [#allocation4], 1 }
 0xfa5   :  { %9711 = vsyncpa [#allocation7], 1 }
 0xfa6   :  { %9712 = vsyncpa [#allocation10], 1 }
 0xfa7   :  { %9713 = vsyncpa [#allocation13], 1 }
 0xfa8   :  { %9714 = vsyncpa [#allocation16], 1 }
 0xfa9   :  { %9715 = vsyncpa [#allocation5], 1 }

</bundles_post_ra>
